<compile_context>
chip_gen: v6e
topology: v6e:2x2x1
jax: 0.10.0
libtpu: 0.0.40
codegen_flags: <defaults>
</compile_context>

<pallas_src>
import jax
import jax.numpy as jnp
from jax import lax
from jax.experimental import pallas as pl
from jax.experimental.pallas import tpu as pltpu


def _round_up(x, m):
    return ((x + m - 1) // m) * m


def _make_ted_conv2d_kernel(KH, KW, H, W):
    """Kernel closure over the static conv geometry."""
    HW = H * W

    def kernel(x_ref, w_ref, b_ref, o_ref):
        # x_ref: (1, Cin, Hp, Wp)   bf16 reflect-padded NCHW, one batch element
        # w_ref: (Cout_pad, K_pad)  bf16 fused, pre-clamped, pre-transposed weights
        # b_ref: (Cout_pad, 1)      f32 fused bias
        # o_ref: (1, Cout, H*W)     f32 NCHW-flattened, lane-dense output
        _, Cin, Hp, Wp = x_ref.shape
        cpad, kpad = w_ref.shape
        _, cout, _ = o_ref.shape

        xc = x_ref[0]                                   # (Cin, Hp, Wp) bf16

        # ---- im2col slab, built once, oriented (K_pad, H*W) so the dot is
        # ---- transposed-by-construction.  K ordering = (kw, kh, c); the wrapper
        # ---- builds the weight matrix with the matching ordering.
        blocks = []
        for kw in range(KW):
            # One lane-slice + ONE (Cin, Hp*W) flatten per kw; every kh row shift below
            # is then a plain lane-offset slice of this slab (no further relayout).
            zkw = xc[:, :, kw:kw + W].reshape(Cin, Hp * W)
            for kh in range(KH):
                blocks.append(zkw[:, kh * W:kh * W + HW])          # (Cin, HW)
        K = KH * KW * Cin
        if kpad > K:
            blocks.append(jnp.zeros((kpad - K, HW), xc.dtype))     # zero K padding
        patches = jnp.concatenate(blocks, axis=0)                  # (K_pad, HW) bf16

        # ---- single MXU matmul (bf16 x bf16 -> f32 accumulate), bias, store.
        acc = jnp.dot(w_ref[...], patches,
                      preferred_element_type=jnp.float32)          # (Cout_pad, HW) f32
        acc = acc + b_ref[...]                                     # lane-broadcast bias
        o_ref[...] = acc[:cout].reshape(1, cout, HW).astype(o_ref.dtype)

    return kernel


def ted_conv2d(x_nchw, params, kernel_sizes, stride=1):
    """Fused Ted_Conv2d forward.

    params: list of (weight (kh, kw, Cin, Cout_i), bias (1, Cout_i)) per branch.
    Returns NCHW (B, sum(Cout_i), H, W), f32.
    """
    # TODO(synk): module default stride=1; strided variant not implemented.
    assert stride == 1
    B, Cin, H, W = x_nchw.shape
    KH = max(k[0] for k in kernel_sizes)
    KW = max(k[1] for k in kernel_sizes)
    assert KH % 2 == 1 and KW % 2 == 1
    ph, pw = (KH - 1) // 2, (KW - 1) // 2
    # Reflect-pad validity / single-halo branch-fusion equivalence (review concern).
    assert H > ph and W > pw, "reflect pad halo must be < spatial size"

    couts = [w.shape[-1] for w, _ in params]
    cout_total = sum(couts)
    cpad = _round_up(cout_total, 8)          # sublane-align the M dim of the matmul
    K = KH * KW * Cin
    kpad = _round_up(K, 128)                 # contraction depth -> full MXU depth

    # ---- one-time weight/bias prep (clamp hoisted out of the kernel) ----------------
    # Zero-embed each branch at the centre of the max-size kernel, clamp (ConstrainedConv2d
    # forward-time clamp), then pre-transpose to (Cout_pad, K_pad) with K order (kw, kh, c)
    # matching the in-kernel im2col construction.
    w_comb = jnp.zeros((KH, KW, Cin, cpad), jnp.float32)
    b_comb = jnp.zeros((cpad, 1), jnp.float32)
    off = 0
    for (kh, kw), (wb, bb) in zip(kernel_sizes, params):
        assert kh % 2 == 1 and kw % 2 == 1
        oh, ow = (KH - kh) // 2, (KW - kw) // 2
        co = wb.shape[-1]
        w_cl = jnp.clip(wb.astype(jnp.float32), -1.0, 1.0)
        w_comb = w_comb.at[oh:oh + kh, ow:ow + kw, :, off:off + co].set(w_cl)
        b_comb = b_comb.at[off:off + co, 0].set(bb.reshape(-1).astype(jnp.float32))
        off += co
    # (KH, KW, Cin, Cpad) -> (Cpad, KW, KH, Cin) -> (Cpad, K): flat k = kw*KH*Cin + kh*Cin + c
    w_mat = jnp.transpose(w_comb, (3, 1, 0, 2)).reshape(cpad, K)
    w_mat = jnp.pad(w_mat, ((0, 0), (0, kpad - K))).astype(jnp.bfloat16)

    # ---- input prep: reflect pad with the shared max halo, bf16 MXU operand ----------
    x_pad = jnp.pad(x_nchw, ((0, 0), (0, 0), (ph, ph), (pw, pw)),
                    mode="reflect").astype(jnp.bfloat16)
    Hp, Wp = H + 2 * ph, W + 2 * pw

    cost = pl.CostEstimate(
        flops=2 * B * H * W * KH * KW * Cin * cout_total,
        transcendentals=0,
        bytes_accessed=(B * Cin * Hp * Wp * 2 + cpad * kpad * 2 + cpad * 4
                        + B * cout_total * H * W * 4),
    )

    # TODO(synk): for large H/W, tile over H with a (KH-1)-row halo (manual halo DMA or
    # element-offset blocks), size tiles to v7x's 64 MiB VMEM / v5e's 16 MiB scoped
    # default (raise vmem_limit_bytes), and give each TensorCore >1 grid step.
    out_flat = pl.pallas_call(
        _make_ted_conv2d_kernel(KH, KW, H, W),
        out_shape=jax.ShapeDtypeStruct((B, cout_total, H * W), x_nchw.dtype),
        grid_spec=pltpu.PrefetchScalarGridSpec(
            num_scalar_prefetch=0,
            grid=(B,),
            in_specs=[
                pl.BlockSpec((1, Cin, Hp, Wp), lambda b: (b, 0, 0, 0)),
                pl.BlockSpec((cpad, kpad), lambda b: (0, 0)),
                pl.BlockSpec((cpad, 1), lambda b: (0, 0)),
            ],
            out_specs=pl.BlockSpec((1, cout_total, H * W), lambda b: (b, 0, 0)),
        ),
        compiler_params=pltpu.CompilerParams(
            dimension_semantics=("parallel",)),
        cost_estimate=cost,
    )(x_pad, w_mat, b_comb)

    # (B, C, H*W) -> (B, C, H, W): metadata-only reshape (already NCHW order).
    return out_flat.reshape(B, cout_total, H, W)


def _reference(x_nchw, params, kernel_sizes):
    """Pure-JAX reference (lax.conv) mirroring the PyTorch forward branch-by-branch,
    using the same bf16 operands / f32 accumulation as the kernel path."""
    outs = []
    x_bf = x_nchw.astype(jnp.bfloat16)
    for (kh, kw), (w, b) in zip(kernel_sizes, params):
        ph, pw = (kh - 1) // 2, (kw - 1) // 2
        xpad = jnp.pad(x_bf, ((0, 0), (0, 0), (ph, ph), (pw, pw)), mode="reflect")
        w_oihw = jnp.transpose(
            jnp.clip(w.astype(jnp.float32), -1.0, 1.0), (3, 2, 0, 1)
        ).astype(jnp.bfloat16)
        y = lax.conv_general_dilated(
            xpad, w_oihw, window_strides=(1, 1), padding="VALID",
            dimension_numbers=("NCHW", "OIHW", "NCHW"),
            preferred_element_type=jnp.float32)
        y = y + b.reshape(1, -1, 1, 1).astype(jnp.float32)
        outs.append(y)
    return jnp.concatenate(outs, axis=-3).astype(x_nchw.dtype)


if __name__ == "__main__":
    key = jax.random.PRNGKey(0)

    # Module config: in_channels=4, out_channels=[2, 3, 3], kernels 1x1/3x3/5x5.
    in_channels = 4
    out_channels = [2, 3, 3]
    kernel_sizes = [(1, 1), (3, 3), (5, 5)]
    B, H, W = 2, 16, 16

    key, kx = jax.random.split(key)
    x = jax.random.normal(kx, (B, in_channels, H, W), dtype=jnp.float32)

    # Deterministic parameter init (scaled so some weights exceed +-1 and the clamp
    # path is actually exercised).
    params = []
    for (kh, kw), co in zip(kernel_sizes, out_channels):
        key, kw_key, kb_key = jax.random.split(key, 3)
        w = 1.5 * jax.random.normal(kw_key, (kh, kw, in_channels, co),
                                    dtype=jnp.float32)
        b = 0.1 * jax.random.normal(kb_key, (1, co), dtype=jnp.float32)
        params.append((w, b))

    out = jax.block_until_ready(ted_conv2d(x, params, kernel_sizes))
    ref = jax.block_until_ready(_reference(x, params, kernel_sizes))

    assert out.shape == (B, sum(out_channels), H, W), out.shape
    # bf16 operands / f32 accumulation in both paths -> only summation-order noise.
    assert jnp.allclose(out, ref, atol=2e-3, rtol=2e-3), \
        float(jnp.max(jnp.abs(out - ref)))

    print("KERNEL_OK")
</pallas_src>

<mosaic_0001>
module attributes {stable_mosaic.version = 11 : i64} {
  func.func @kernel(%arg0: i32, %arg1: memref<1x4x20x20xbf16, #tpu.memory_space<vmem>>, %arg2: memref<8x128xbf16, #tpu.memory_space<vmem>>, %arg3: memref<8x1xf32, #tpu.memory_space<vmem>>, %arg4: memref<1x8x256xf32, #tpu.memory_space<vmem>>) attributes {dimension_semantics = [#tpu.dimension_semantics<parallel>], iteration_bounds = array<i64: 2>, scalar_prefetch = 0 : i64, scratch_operands = 0 : i64, tpu.core_type = #tpu.core_type<tc>, window_params = [{transform_indices = @transform_0, window_bounds = array<i64: 1, 4, 20, 20>}, {pipeline_mode = #tpu.pipeline_mode<synchronous>, transform_indices = @transform_1, window_bounds = array<i64: 8, 128>}, {pipeline_mode = #tpu.pipeline_mode<synchronous>, transform_indices = @transform_2, window_bounds = array<i64: 8, 1>}, {transform_indices = @transform_3, window_bounds = array<i64: 1, 8, 256>}]} {
    %c0 = arith.constant 0 : index
    %c0_0 = arith.constant 0 : index
    %c0_1 = arith.constant 0 : index
    %c0_2 = arith.constant 0 : index
    %0 = vector.load %arg1[%c0, %c0_0, %c0_1, %c0_2] : memref<1x4x20x20xbf16, #tpu.memory_space<vmem>>, vector<1x4x20x20xbf16>
    %1 = vector.shape_cast %0 : vector<1x4x20x20xbf16> to vector<4x20x20xbf16>
    %2 = vector.extract_strided_slice %1 {offsets = [0, 0, 0], sizes = [4, 20, 16], strides = [1, 1, 1]} : vector<4x20x20xbf16> to vector<4x20x16xbf16>
    %3 = vector.shape_cast %2 : vector<4x20x16xbf16> to vector<4x320xbf16>
    %4 = vector.extract_strided_slice %3 {offsets = [0, 0], sizes = [4, 256], strides = [1, 1]} : vector<4x320xbf16> to vector<4x256xbf16>
    %5 = vector.extract_strided_slice %3 {offsets = [0, 16], sizes = [4, 256], strides = [1, 1]} : vector<4x320xbf16> to vector<4x256xbf16>
    %6 = vector.extract_strided_slice %3 {offsets = [0, 32], sizes = [4, 256], strides = [1, 1]} : vector<4x320xbf16> to vector<4x256xbf16>
    %7 = vector.extract_strided_slice %3 {offsets = [0, 48], sizes = [4, 256], strides = [1, 1]} : vector<4x320xbf16> to vector<4x256xbf16>
    %8 = vector.extract_strided_slice %3 {offsets = [0, 64], sizes = [4, 256], strides = [1, 1]} : vector<4x320xbf16> to vector<4x256xbf16>
    %9 = vector.extract_strided_slice %1 {offsets = [0, 0, 1], sizes = [4, 20, 16], strides = [1, 1, 1]} : vector<4x20x20xbf16> to vector<4x20x16xbf16>
    %10 = vector.shape_cast %9 : vector<4x20x16xbf16> to vector<4x320xbf16>
    %11 = vector.extract_strided_slice %10 {offsets = [0, 0], sizes = [4, 256], strides = [1, 1]} : vector<4x320xbf16> to vector<4x256xbf16>
    %12 = vector.extract_strided_slice %10 {offsets = [0, 16], sizes = [4, 256], strides = [1, 1]} : vector<4x320xbf16> to vector<4x256xbf16>
    %13 = vector.extract_strided_slice %10 {offsets = [0, 32], sizes = [4, 256], strides = [1, 1]} : vector<4x320xbf16> to vector<4x256xbf16>
    %14 = vector.extract_strided_slice %10 {offsets = [0, 48], sizes = [4, 256], strides = [1, 1]} : vector<4x320xbf16> to vector<4x256xbf16>
    %15 = vector.extract_strided_slice %10 {offsets = [0, 64], sizes = [4, 256], strides = [1, 1]} : vector<4x320xbf16> to vector<4x256xbf16>
    %16 = vector.extract_strided_slice %1 {offsets = [0, 0, 2], sizes = [4, 20, 16], strides = [1, 1, 1]} : vector<4x20x20xbf16> to vector<4x20x16xbf16>
    %17 = vector.shape_cast %16 : vector<4x20x16xbf16> to vector<4x320xbf16>
    %18 = vector.extract_strided_slice %17 {offsets = [0, 0], sizes = [4, 256], strides = [1, 1]} : vector<4x320xbf16> to vector<4x256xbf16>
    %19 = vector.extract_strided_slice %17 {offsets = [0, 16], sizes = [4, 256], strides = [1, 1]} : vector<4x320xbf16> to vector<4x256xbf16>
    %20 = vector.extract_strided_slice %17 {offsets = [0, 32], sizes = [4, 256], strides = [1, 1]} : vector<4x320xbf16> to vector<4x256xbf16>
    %21 = vector.extract_strided_slice %17 {offsets = [0, 48], sizes = [4, 256], strides = [1, 1]} : vector<4x320xbf16> to vector<4x256xbf16>
    %22 = vector.extract_strided_slice %17 {offsets = [0, 64], sizes = [4, 256], strides = [1, 1]} : vector<4x320xbf16> to vector<4x256xbf16>
    %23 = vector.extract_strided_slice %1 {offsets = [0, 0, 3], sizes = [4, 20, 16], strides = [1, 1, 1]} : vector<4x20x20xbf16> to vector<4x20x16xbf16>
    %24 = vector.shape_cast %23 : vector<4x20x16xbf16> to vector<4x320xbf16>
    %25 = vector.extract_strided_slice %24 {offsets = [0, 0], sizes = [4, 256], strides = [1, 1]} : vector<4x320xbf16> to vector<4x256xbf16>
    %26 = vector.extract_strided_slice %24 {offsets = [0, 16], sizes = [4, 256], strides = [1, 1]} : vector<4x320xbf16> to vector<4x256xbf16>
    %27 = vector.extract_strided_slice %24 {offsets = [0, 32], sizes = [4, 256], strides = [1, 1]} : vector<4x320xbf16> to vector<4x256xbf16>
    %28 = vector.extract_strided_slice %24 {offsets = [0, 48], sizes = [4, 256], strides = [1, 1]} : vector<4x320xbf16> to vector<4x256xbf16>
    %29 = vector.extract_strided_slice %24 {offsets = [0, 64], sizes = [4, 256], strides = [1, 1]} : vector<4x320xbf16> to vector<4x256xbf16>
    %30 = vector.extract_strided_slice %1 {offsets = [0, 0, 4], sizes = [4, 20, 16], strides = [1, 1, 1]} : vector<4x20x20xbf16> to vector<4x20x16xbf16>
    %31 = vector.shape_cast %30 : vector<4x20x16xbf16> to vector<4x320xbf16>
    %32 = vector.extract_strided_slice %31 {offsets = [0, 0], sizes = [4, 256], strides = [1, 1]} : vector<4x320xbf16> to vector<4x256xbf16>
    %33 = vector.extract_strided_slice %31 {offsets = [0, 16], sizes = [4, 256], strides = [1, 1]} : vector<4x320xbf16> to vector<4x256xbf16>
    %34 = vector.extract_strided_slice %31 {offsets = [0, 32], sizes = [4, 256], strides = [1, 1]} : vector<4x320xbf16> to vector<4x256xbf16>
    %35 = vector.extract_strided_slice %31 {offsets = [0, 48], sizes = [4, 256], strides = [1, 1]} : vector<4x320xbf16> to vector<4x256xbf16>
    %36 = vector.extract_strided_slice %31 {offsets = [0, 64], sizes = [4, 256], strides = [1, 1]} : vector<4x320xbf16> to vector<4x256xbf16>
    %cst = arith.constant 0.000000e+00 : bf16
    %37 = vector.broadcast %cst : bf16 to vector<28x256xbf16>
    %38 = tpu.concatenate %4, %5, %6, %7, %8, %11, %12, %13, %14, %15, %18, %19, %20, %21, %22, %25 in 0 : vector<4x256xbf16>, vector<4x256xbf16>, vector<4x256xbf16>, vector<4x256xbf16>, vector<4x256xbf16>, vector<4x256xbf16>, vector<4x256xbf16>, vector<4x256xbf16>, vector<4x256xbf16>, vector<4x256xbf16>, vector<4x256xbf16>, vector<4x256xbf16>, vector<4x256xbf16>, vector<4x256xbf16>, vector<4x256xbf16>, vector<4x256xbf16> -> vector<64x256xbf16>
    %39 = tpu.concatenate %26, %27, %28, %29, %32, %33, %34, %35, %36, %37 in 0 : vector<4x256xbf16>, vector<4x256xbf16>, vector<4x256xbf16>, vector<4x256xbf16>, vector<4x256xbf16>, vector<4x256xbf16>, vector<4x256xbf16>, vector<4x256xbf16>, vector<4x256xbf16>, vector<28x256xbf16> -> vector<64x256xbf16>
    %40 = tpu.concatenate %38, %39 in 0 : vector<64x256xbf16>, vector<64x256xbf16> -> vector<128x256xbf16>
    %c0_3 = arith.constant 0 : index
    %c0_4 = arith.constant 0 : index
    %41 = vector.load %arg2[%c0_3, %c0_4] : memref<8x128xbf16, #tpu.memory_space<vmem>>, vector<8x128xbf16>
    %cst_5 = arith.constant dense<0.000000e+00> : vector<8x256xf32>
    %42 = tpu.matmul %41, %40, %cst_5 {dimension_numbers = #tpu.dot_dimension_numbers<[1], [0], [0], [1], [0, 0, 1, 1], [], []>} : vector<8x128xbf16>, vector<128x256xbf16>, vector<8x256xf32> -> vector<8x256xf32>
    %c0_6 = arith.constant 0 : index
    %c0_7 = arith.constant 0 : index
    %43 = vector.load %arg3[%c0_6, %c0_7] : memref<8x1xf32, #tpu.memory_space<vmem>>, vector<8x1xf32>
    %44 = vector.broadcast %43 : vector<8x1xf32> to vector<8x256xf32>
    %45 = arith.addf %42, %44 : vector<8x256xf32>
    %46 = vector.shape_cast %45 : vector<8x256xf32> to vector<1x8x256xf32>
    %c0_8 = arith.constant 0 : index
    %c0_9 = arith.constant 0 : index
    %c0_10 = arith.constant 0 : index
    %47 = vector.load %arg4[%c0_8, %c0_9, %c0_10] : memref<1x8x256xf32, #tpu.memory_space<vmem>>, vector<1x8x256xf32>
    tpu.vector_store %arg4[%c0_8, %c0_9, %c0_10], %46 {strides = array<i32>} : memref<1x8x256xf32, #tpu.memory_space<vmem>>, vector<1x8x256xf32>,
    return
  }
  func.func @transform_0(%arg0: i32) -> (i32, i32, i32, i32) {
    %c0_i32 = arith.constant 0 : i32
    %c0_i32_0 = arith.constant 0 : i32
    %c0_i32_1 = arith.constant 0 : i32
    %c0_i32_2 = arith.constant 0 : i32
    return %arg0, %c0_i32, %c0_i32_0, %c0_i32_1 : i32, i32, i32, i32
  }
  func.func @transform_1(%arg0: i32) -> (i32, i32) {
    %c0_i32 = arith.constant 0 : i32
    %c0_i32_0 = arith.constant 0 : i32
    %c0_i32_1 = arith.constant 0 : i32
    return %c0_i32, %c0_i32_0 : i32, i32
  }
  func.func @transform_2(%arg0: i32) -> (i32, i32) {
    %c0_i32 = arith.constant 0 : i32
    %c0_i32_0 = arith.constant 0 : i32
    %c0_i32_1 = arith.constant 0 : i32
    return %c0_i32, %c0_i32_0 : i32, i32
  }
  func.func @transform_3(%arg0: i32) -> (i32, i32, i32) {
    %c0_i32 = arith.constant 0 : i32
    %c0_i32_0 = arith.constant 0 : i32
    %c0_i32_1 = arith.constant 0 : i32
    return %arg0, %c0_i32, %c0_i32_0 : i32, i32, i32
  }
}

</mosaic_0001>

<bundles_post_ra>
// kernel: tpu_custom_call.1
= control target key start
LH: loop header
LB: loop body
LE: loop exit
PB: predicated region body
PF: predicated region fallthrough
CT: control target
= control target key end

     0   :  { %8 = vsyncpa [#allocation3], 0  ;;  %s4072_s0 = inlined_call_operand.vmem [shape: bf16[2,4,20,20], index: 0, kind: input, shape index: {}]   ;;  %s4073_s1 = inlined_call_operand.vmem [shape: bf16[8,128], index: 1, kind: input, shape index: {}]   ;;  %s4074_s2 = inlined_call_operand.vmem [shape: f32[8,1], index: 2, kind: input, shape index: {}]   ;;  %s4075_s3 = inlined_call_operand.hbm [shape: f32[2,8,256], index: 3, kind: output, shape index: {}]  }
   0x1   :  { %10 = vsyncpa [#allocation3 + $0x1], 0  ;;  %s2656_s12 = smov 0   ;;  %s2658_s13 = smov 0  }
   0x2   :  { %s2660_s14 = smov 0   ;;  %s2662_s15 = smov 0  }
   0x3 LB: > { %s2677_s16 = sadd.s32 4294967295, %s2619_s15   ;;  %s2392_s17 = sadd.s32 4294967294, %s2619_s15   ;;  %s2619_s15 = sphi %s2662_s15, %s4134_s15   ;;  %s2615_s14 = sphi %s2660_s14, %s4133_s14   ;;  %s2611_s13 = sphi %s2658_s13, %s4132_s13   ;;  %s2607_s12 = sphi %s2656_s12, %s4131_s12  }
   0x4   : > { %s2681_s18 = sadd.s32 1, %s2619_s15   ;;  %s91_s19 = sadd.s32 1, %s2615_s14 }
   0x5   : > { %s88_s20 = ssub.s32 %s2619_s15, %s2681_s18  ;;  %p101_p0 = scmp.ne.s32.totalorder %s2615_s14, %s2611_s13 }
   0x6   : > { %p89_p1 = scmp.eq.s32.totalorder %s88_s20, 0  ;;  %p102_p2 = scmp.eq.s32.totalorder %s2677_s16, 1 }
   0x7   : > { %p107_p3 = scmp.ne.s32.totalorder %s2611_s13, %s2607_s12  ;;  %p108_p4 = scmp.eq.s32.totalorder %s2392_s17, 1 }
   0x8   : > { %s2692_s21 = scalar_select %p89_p1, %s2615_s14, %s91_s19  }
   0x9   : > { %p2694_p5 = por %p102_p2, %p101_p0  ;;  %p2698_p6 = por %p108_p4, %p107_p3 }
   0xa   : > { %p2395_p7 = scmp.ge.s32.totalorder %s2619_s15, 1  ;;  %p140_p8 = scmp.lt.s32.totalorder %s2619_s15, 3 }
   0xc   : > { %p141_p9 = pnand %p2395_p7, %p140_p8 }
   0xe   : > { %144 = sbr.rel (%p141_p9) target bundleno = 938 (0x3aa), region = 32 }
  0x13   : > { %p164_p10 = scmp.lt.s32.totalorder %s2677_s16, 1  ;;  %v4077_v0 = vmov 0   ;;  %s2622_s29 = smov 124   ;;  %v2626_v13 = vmov 1983009808   ;;  %v185_v15 = vlaneseq  ;;  %vm456_vm0 = vcmask 130048  }
  0x14   : > { %2307 = vmatprep.mubr.bf16.mxu0 %v4077_v0  ;;  %2543 = vset.pattern.permute.xlu1 %v4077_v0  ;;  %s2623_s30 = smov 125   ;;  %s2624_s4 = smov 126   ;;  %v183_v14 = vunpack.c.l.s4 %v2626_v13  ;;  %v2627_v19 = vmov 1934713408   ;;  %vm460_vm1 = vcmask 261120   ;;  %vm463_vm2 = vcmask 392192  }
  0x15   : > { %s165_s24 = scalar_select %p164_p10, %s2677_s16, 1  ;;  %2544 = vset.pattern.permute.xlu0 %v4077_v0  ;;  %v186_v17 = vshrl.u32 %v185_v15, 7  ;;  %v199_v20 = vunpack.c.l.s4 %v2627_v19  ;;  %vm466_vm3 = vcmask 523264   ;;  %vm469_vm4 = vcmask 654336  }
  0x16   : > { %s2625_s5 = smov 127   ;;  %v184_v16 = vunpack.c.0.s8 %v183_v14  ;;  %s2628_s6 = smov 64   ;;  %vm475_vm5 = vcmask 916480   ;;  %vm472_vm6 = vcmask 785408   ;;  %vm2040_vm7 = vcmask 1041408  }
  0x17   : > { %s2489_s25 = smul.u32 48, %s165_s24  ;;  %v200_v23 = vunpack.c.0.s8 %v199_v20  ;;  %s2629_s7 = smov 16   ;;  %vm2045_vm8 = vcmask 1043456   ;;  %vm2050_vm9 = vcmask 1045504  }
  0x18   : > { %v2762_v18 = vsub.s32 %v184_v16, %v186_v17  ;;  %s2630_s8 = smov 32   ;;  %s2631_s9 = smov 96  }
  0x19   : > { %s2712_s28 = scalar_lea.vmem %s4072_s0, %s2489_s25  ;;  %v2766_v28 = vsub.s32 %v200_v23, %v186_v17  ;;  %s2632_s10 = smov 80  }
  0x1a   : > { %v2715_v1 = vld [vmem:[%s2712_s28 + $0x1c] sm:$0xf]  ;;  %v2718_v2 = vld [vmem:[%s2712_s28 + $0x4] sm:$0xf]  ;;  %v2725_v3 = vld [vmem:[%s2712_s28 + $0x28] sm:$0xf] }
  0x1b   : > { %1567 = vrot.lane.b32.xlu1 %v2715_v1, %s2622_s29  ;;  %1555 = vrot.lane.b32.xlu0 %v2718_v2, %s2622_s29  ;;  %v2728_v4 = vld [vmem:[%s2712_s28 + $0x10] sm:$0xf]  ;;  %v173_v5 = vld [vmem:[%s2712_s28 + $0xc] sm:$0xf]  ;;  %s2633_s11 = smov 48   ;;  %s2634_s17 = smov 112  }
  0x1c   : > { %v170_v6 = vld [vmem:[%s2712_s28] sm:$0xf]  ;;  %v179_v7 = vld [vmem:[%s2712_s28 + $0x24] sm:$0xf]  ;;  %v176_v8 = vld [vmem:[%s2712_s28 + $0x18] sm:$0xf] }
  0x1d   : > { %v175_v9 = vld [vmem:[%s2712_s28 + $0x14] sm:$0x3]  ;;  %v172_v10 = vld [vmem:[%s2712_s28 + $0x8] sm:$0x3]  ;;  %v181_v11 = vld [vmem:[%s2712_s28 + $0x2c] sm:$0x3] }
  0x1e   : > { %v178_v12 = vld [vmem:[%s2712_s28 + $0x20] sm:$0x3]  ;;  %s161_s26 = sand.u32 1, %s2611_s13  }
  0x1f   : > { %1573 = vrot.lane.b32.xlu1 %v2725_v3, %s2622_s29  ;;  %1561 = vrot.lane.b32.xlu0 %v2728_v4, %s2622_s29  ;;  %s2396_s27 = sshll.u32 %s161_s26, 4 }
  0x23   : > { %1559 = vrot.lane.b32.xlu1 %v173_v5, %s2622_s29  ;;  %1553 = vrot.lane.b32.xlu0 %v170_v6, %s2622_s29 }
  0x27   : > { %1571 = vrot.lane.b32.xlu1 %v179_v7, %s2622_s29  ;;  %1565 = vrot.lane.b32.xlu0 %v176_v8, %s2622_s29 }
  0x2b   : > { %1214 = vrot.lane.b32.xlu1 %v2728_v4, %s2623_s30  ;;  %1208 = vrot.lane.b32.xlu0 %v2718_v2, %s2623_s30 }
  0x2f   : > { %1226 = vrot.lane.b32.xlu1 %v2725_v3, %s2623_s30  ;;  %1220 = vrot.lane.b32.xlu0 %v2715_v1, %s2623_s30 }
  0x33   : > { %1212 = vrot.lane.b32.xlu1 %v173_v5, %s2623_s30  ;;  %1206 = vrot.lane.b32.xlu0 %v170_v6, %s2623_s30 }
  0x37   : > { %1224 = vrot.lane.b32.xlu1 %v179_v7, %s2623_s30  ;;  %1218 = vrot.lane.b32.xlu0 %v176_v8, %s2623_s30 }
  0x3b   : > { %1563 = vrot.lane.b32.xlu1 %v175_v9, %s2622_s29  ;;  %1557 = vrot.lane.b32.xlu0 %v172_v10, %s2622_s29 }
  0x3f   : > { %1575 = vrot.lane.b32.xlu1 %v181_v11, %s2622_s29  ;;  %1569 = vrot.lane.b32.xlu0 %v178_v12, %s2622_s29  ;;  %s163_s29 = scalar_lea.vmem [#allocation2], %s2396_s27 }
  0x43   : > { %1216 = vrot.lane.b32.xlu1 %v175_v9, %s2623_s30  ;;  %1210 = vrot.lane.b32.xlu0 %v172_v10, %s2623_s30 }
  0x47   : > { %1228 = vrot.lane.b32.xlu1 %v181_v11, %s2623_s30  ;;  %1222 = vrot.lane.b32.xlu0 %v178_v12, %s2623_s30  ;;  %s2333_s30 = sshll.u32 %s163_s29, 4  ;;  %s4033_s30 = int_to_ptr.vmem [resolvable:$true] %s2333_s30 }
  0x4b   : > { %861 = vrot.lane.b32.xlu0 %v2718_v2, %s2624_s4  ;;  %867 = vrot.lane.b32.xlu1 %v2728_v4, %s2624_s4 }
  0x4f   : > { %873 = vrot.lane.b32.xlu0 %v2715_v1, %s2624_s4  ;;  %879 = vrot.lane.b32.xlu1 %v2725_v3, %s2624_s4 }
  0x53   : > { %859 = vrot.lane.b32.xlu0 %v170_v6, %s2624_s4  ;;  %865 = vrot.lane.b32.xlu1 %v173_v5, %s2624_s4 }
  0x57   : > { %871 = vrot.lane.b32.xlu0 %v176_v8, %s2624_s4  ;;  %877 = vrot.lane.b32.xlu1 %v179_v7, %s2624_s4 }
  0x5b   : > { %520 = vrot.lane.b32.xlu0 %v2728_v4, %s2625_s5  ;;  %514 = vrot.lane.b32.xlu1 %v2718_v2, %s2625_s5 }
  0x5f   : > { %532 = vrot.lane.b32.xlu0 %v2725_v3, %s2625_s5  ;;  %526 = vrot.lane.b32.xlu1 %v2715_v1, %s2625_s5 }
  0x63   : > { %518 = vrot.lane.b32.xlu0 %v173_v5, %s2625_s5  ;;  %512 = vrot.lane.b32.xlu1 %v170_v6, %s2625_s5 }
  0x67   : > { %530 = vrot.lane.b32.xlu0 %v179_v7, %s2625_s5  ;;  %524 = vrot.lane.b32.xlu1 %v176_v8, %s2625_s5 }
  0x6b   : > { %869 = vrot.lane.b32.xlu0 %v175_v9, %s2624_s4  ;;  %863 = vrot.lane.b32.xlu1 %v172_v10, %s2624_s4 }
  0x6f   : > { %881 = vrot.lane.b32.xlu0 %v181_v11, %s2624_s4  ;;  %875 = vrot.lane.b32.xlu1 %v178_v12, %s2624_s4 }
  0x73   : > { %522 = vrot.lane.b32.xlu0 %v175_v9, %s2625_s5  ;;  %516 = vrot.lane.b32.xlu1 %v172_v10, %s2625_s5 }
  0x77   : > { %534 = vrot.lane.b32.xlu0 %v181_v11, %s2625_s5  ;;  %528 = vrot.lane.b32.xlu1 %v178_v12, %s2625_s5 }
  0x8d   : > { %v1568_v21 = vpop.permute.xlu1 %1567  ;;  %v1556_v22 = vpop.permute.xlu0 %1555 }
  0x8e   : > { %v1660_v24 = vrot.slane %v1568_v21, %v2762_v18  ;;  %v1652_v25 = vrot.slane %v1556_v22, %v2762_v18 }
  0x90   : > { %v1662_v29 = vcombine.high %v1652_v25, %v1660_v24  ;;  %v1661_v32 = vcombine.low %v1652_v25, %v1660_v24 }
  0x91   : > { %v1574_v26 = vpop.permute.xlu1 %1573  ;;  %v1562_v27 = vpop.permute.xlu0 %1561 }
  0x92   : > { %v1694_v30 = vrot.slane %v1574_v26, %v2762_v18  ;;  %v1686_v31 = vrot.slane %v1562_v27, %v2762_v18  ;;  %v2771_v37 = vrot.slane %v1662_v29, %v2766_v28  ;;  %v2780_v40 = vrot.slane %v1661_v32, %v2766_v28 }
  0x94   : > { %v1695_v33 = vcombine.low %v1686_v31, %v1694_v30  ;;  %v1696_v34 = vcombine.high %v1686_v31, %v1694_v30 }
  0x95   : > { %v1560_v35 = vpop.permute.xlu1 %1559  ;;  %v1554_v36 = vpop.permute.xlu0 %1553 }
  0x96   : > { %v2774_v38 = vrot.slane %v1695_v33, %v2766_v28  ;;  %v2777_v39 = vrot.slane %v1696_v34, %v2766_v28  ;;  %v1618_v42 = vrot.slane %v1560_v35, %v2762_v18  ;;  %v1584_v46 = vrot.slane %v1554_v36, %v2762_v18 }
  0x97   : > { %v1762_v36 = vshrl.u32 %v2780_v40, 16 }
  0x98   : > { %v1773_v41 = vpack.i.b16 %v2777_v39, %v2771_v37  ;;  %v1763_v24 = vshrl.u32 %v2774_v38, 16 }
  0x99   : > { %v1572_v43 = vpop.permute.xlu1 %1571  ;;  %v1566_v44 = vpop.permute.xlu0 %1565 }
  0x9a   : > { %v1626_v47 = vrot.slane %v1572_v43, %v2762_v18  ;;  %v1592_v48 = vrot.slane %v1566_v44, %v2762_v18  ;;  %v2476_v49 = vcombine.low %v1773_v41, %v1773_v41  ;;  %v2850_v41 = vcombine.high %v2774_v38, %v4077_v0 }
  0x9c   : > { %v1628_v50 = vcombine.high %v1618_v42, %v1626_v47  ;;  %v1594_v51 = vcombine.high %v1584_v46, %v1592_v48  ;;  %1837 = vrot.lane.b32.xlu0 %v2476_v49, %s2628_s6  ;;  %v1627_v5 = vcombine.low %v1618_v42, %v1626_v47  ;;  %v1593_v6 = vcombine.low %v1584_v46, %v1592_v48 }
  0x9d   : > { %v1215_v52 = vpop.permute.xlu1 %1214  ;;  %v1209_v53 = vpop.permute.xlu0 %1208  ;;  %v1764_v49 = vpack.i.b16 %v1763_v24, %v1762_v36 }
  0x9e   : > { %v2792_v54 = vrot.slane %v1628_v50, %v2766_v28  ;;  %v2795_v55 = vrot.slane %v1594_v51, %v2766_v28  ;;  %v2807_v11 = vrot.slane %v1627_v5, %v2766_v28  ;;  %v2810_v12 = vrot.slane %v1593_v6, %v2766_v28 }
  0x9f   : > { %v2813_v15 = vrot.slane %v1215_v52, %v2762_v18  ;;  %v2816_v16 = vrot.slane %v1209_v53, %v2762_v18 }
  0xa0   : > { %v1749_v56 = vpack.i.b16 %v2792_v54, %v2795_v55  ;;  %v1738_v25 = vshrl.u32 %v2810_v12, 16  ;;  %v1739_v26 = vshrl.u32 %v2807_v11, 16  ;;  %v2868_v50 = vcombine.high %v2810_v12, %v4077_v0 }
  0xa1   : > { %v1227_v57 = vpop.permute.xlu1 %1226  ;;  %v1221_v58 = vpop.permute.xlu0 %1220 }
  0xa2   : > { %v2469_v59 = vcombine.low %v1749_v56, %v1749_v56  ;;  %v2801_v9 = vrot.slane %v1227_v57, %v2762_v18  ;;  %v2804_v10 = vrot.slane %v1221_v58, %v2762_v18  ;;  %v1740_v57 = vpack.i.b16 %v1739_v26, %v1738_v25 }
  0xa3   : > { %v2872_v58 = vcombine.high %v2807_v11, %v4077_v0  ;;  %v2912_v26 = vcombine.high %v2777_v39, %v4077_v0 }
  0xa4   : > { %1809 = vrot.lane.b32.xlu0 %v2469_v59, %s2628_s6  ;;  %v1348_v20 = vcombine.low %v2813_v15, %v2801_v9  ;;  %v1314_v21 = vcombine.low %v2816_v16, %v2804_v10 }
  0xa5   : > { %v1213_v60 = vpop.permute.xlu1 %1212  ;;  %v1207_v61 = vpop.permute.xlu0 %1206 }
  0xa6   : > { %v2853_v42 = vrot.slane %v1348_v20, %v2766_v28  ;;  %v2856_v43 = vrot.slane %v1314_v21, %v2766_v28  ;;  %v2861_v47 = vrot.slane %v1213_v60, %v2762_v18  ;;  %v2864_v48 = vrot.slane %v1207_v61, %v2762_v18 }
  0xa7   : > { %v2882_v61 = vcombine.high %v2780_v40, %v4077_v0  ;;  %v1743_v21 = vpack.i.b16 %v2872_v58, %v2868_v50 }
  0xa8   : > { %4091 = vst [vmem:[#allocation5_spill] sm:$0xff] %v2856_v43  ;;  %v1415_v5 = vshrl.u32 %v2856_v43, 16  ;;  %v1416_v6 = vshrl.u32 %v2853_v42, 16 }
  0xa9   : > { %v1225_v62 = vpop.permute.xlu1 %1224  ;;  %v1219_v63 = vpop.permute.xlu0 %1218  ;;  %v1767_v20 = vpack.i.b16 %v2850_v41, %v2882_v61 }
  0xaa   : > { %v2842_v34 = vrot.slane %v1225_v62, %v2762_v18  ;;  %v2845_v35 = vrot.slane %v1219_v63, %v2762_v18  ;;  %v2886_v62 = vcombine.high %v2856_v43, %v4077_v0  ;;  %v2890_v63 = vcombine.high %v2853_v42, %v4077_v0 }
  0xab   : > { %v1417_v36 = vpack.i.b16 %v1416_v6, %v1415_v5 }
  0xac   : > { %v1280_v59 = vcombine.low %v2861_v47, %v2842_v34  ;;  %v1246_v60 = vcombine.low %v2864_v48, %v2845_v35 }
  0xad   : > { %v1564_v7 = vpop.permute.xlu1 %1563  ;;  %v1558_v8 = vpop.permute.xlu0 %1557  ;;  %v2456_v6 = vcombine.low %v1417_v36, %v1417_v36  ;;  %v2966_v36 = vcombine.high %v2792_v54, %v4077_v0 }
  0xae   : > { %v2903_v24 = vrot.slane %v1280_v59, %v2766_v28  ;;  %v2906_v25 = vrot.slane %v1246_v60, %v2766_v28  ;;  %v1315_v59 = vcombine.high %v2816_v16, %v2804_v10  ;;  %v1247_v10 = vcombine.high %v2864_v48, %v2845_v35 }
  0xaf   : > { %v1745_v16 = vshrl.u32 %v2872_v58, 16 }
  0xb0   : > { %4092 = vst [vmem:[#allocation6_spill] sm:$0xff] %v2903_v24  ;;  %4093 = vst [vmem:[#allocation7_spill] sm:$0xff] %v2906_v25 }
  0xb1   : > { %v1576_v13 = vpop.permute.xlu1 %1575  ;;  %v1570_v14 = vpop.permute.xlu0 %1569 }
  0xb2   : > { %v1726_v17 = vcombine.low %v1564_v7, %v1576_v13  ;;  %v1715_v19 = vcombine.low %v1558_v8, %v1570_v14 }
  0xb4   : > { %v2823_v22 = vrot.slane %v1726_v17, %v2766_v28  ;;  %v2826_v23 = vrot.slane %v1715_v19, %v2766_v28  ;;  %v2473_v17 = vcombine.low %v1764_v49, %v1764_v49  ;;  %v2466_v19 = vcombine.low %v1740_v57, %v1740_v57 }
  0xb5   : > { %v1217_v27 = vpop.permute.xlu1 %1216  ;;  %v1211_v29 = vpop.permute.xlu0 %1210  ;;  %v1774_v57 = vshrl.u32 %v2771_v37, 16 }
  0xb6   : > { %v1786_v30 = vshrl.u32 %v2826_v23, 16  ;;  %v1787_v31 = vshrl.u32 %v2823_v22, 16  ;;  %v2835_v32 = vcombine.high %v2826_v23, %v4077_v0  ;;  %v2839_v33 = vcombine.high %v2823_v22, %v4077_v0 }
  0xb8   : > { %v1788_v44 = vpack.i.b16 %v1787_v31, %v1786_v30  ;;  %v1791_v46 = vpack.i.b16 %v2839_v33, %v2835_v32  ;;  %v1420_v31 = vpack.i.b16 %v2890_v63, %v2886_v62 }
  0xb9   : > { %v1229_v51 = vpop.permute.xlu1 %1228  ;;  %v1223_v52 = vpop.permute.xlu0 %1222 }
  0xba   : > { %v2480_v53 = vcombine.low %v1788_v44, %v1788_v44  ;;  %v2481_v56 = vcombine.low %v1791_v46, %v1791_v46  ;;  %v1379_v7 = vcombine.low %v1217_v27, %v1229_v51  ;;  %v1368_v8 = vcombine.low %v1211_v29, %v1223_v52 }
  0xbb   : > { %v1775_v27 = vshrl.u32 %v2777_v39, 16  ;;  %v2474_v39 = vcombine.low %v1767_v20, %v1767_v20  ;;  %v2467_v52 = vcombine.low %v1743_v21, %v1743_v21  ;;  %v2457_v5 = vcombine.low %v1420_v31, %v1420_v31 }
  0xbc   : > { %1853 = vrot.lane.b32.xlu0 %v2480_v53, %s2629_s7  ;;  %1857 = vrot.lane.b32.xlu1 %v2481_v56, %s2630_s8  ;;  %v2922_v44 = vrot.slane %v1379_v7, %v2766_v28  ;;  %v2925_v46 = vrot.slane %v1368_v8, %v2766_v28  ;;  %v2933_v53 = vcombine.high %v2771_v37, %v4077_v0  ;;  %v1391_v21 = vshrl.u32 %v2906_v25, 16 }
  0xbd   : > { %v2894_v13 = vpop.permute.xlu0 %861  ;;  %v2896_v14 = vpop.permute.xlu1 %867  ;;  %v1776_v7 = vpack.i.b16 %v1775_v27, %v1774_v57  ;;  %v2956_v20 = vcombine.high %v2903_v24, %v4077_v0  ;;  %v1392_v31 = vshrl.u32 %v2903_v24, 16  ;;  %v2962_v27 = vcombine.high %v2795_v55, %v4077_v0 }
  0xbe   : > { %4094 = vst [vmem:[#allocation8_spill] sm:$0xff] %v2922_v44  ;;  %4095 = vst [vmem:[#allocation9_spill] sm:$0xff] %v2925_v46  ;;  %v1779_v60 = vpack.i.b16 %v2912_v26, %v2933_v53  ;;  %v1349_v57 = vcombine.high %v2813_v15, %v2801_v9  ;;  %v1769_v29 = vshrl.u32 %v2850_v41, 16  ;;  %v1281_v9 = vcombine.high %v2861_v47, %v2842_v34 }
  0xbf   : > { %v2477_v45 = vcombine.low %v1776_v7, %v1776_v7  ;;  %v1744_v15 = vshrl.u32 %v2868_v50, 16  ;;  %v1329_v41 = vrot.slane %v1315_v59, %v2766_v28  ;;  %v1768_v7 = vshrl.u32 %v2882_v61, 16 }
  0xc0   : > { %1825 = vrot.lane.b32.xlu0 %v2473_v17, %s2629_s7  ;;  %1797 = vrot.lane.b32.xlu1 %v2466_v19, %s2629_s7  ;;  %v2952_v19 = vcombine.high %v2906_v25, %v4077_v0  ;;  %v2478_v30 = vcombine.low %v1779_v60, %v1779_v60  ;;  %v1363_v60 = vrot.slane %v1349_v57, %v2766_v28  ;;  %v1780_v58 = vshrl.u32 %v2933_v53, 16 }
  0xc1   : > { %v2927_v49 = vpop.permute.xlu0 %873  ;;  %v2929_v51 = vpop.permute.xlu1 %879  ;;  %v1261_v59 = vrot.slane %v1247_v10, %v2766_v28  ;;  %v1746_v61 = vpack.i.b16 %v1745_v16, %v1744_v15  ;;  %v1756_v57 = vshrl.u32 %v2962_v27, 16 }
  0xc2   : > { %v1397_v10 = vshrl.u32 %v2952_v19, 16 }
  0xc3   : > { %v3025_v15 = vcombine.high %v1261_v59, %v4077_v0 }
  0xc4   : > { %1829 = vrot.lane.b32.xlu0 %v2474_v39, %s2630_s8  ;;  %1801 = vrot.lane.b32.xlu1 %v2467_v52, %s2630_s8  ;;  %v1750_v39 = vshrl.u32 %v2795_v55, 16  ;;  %v1751_v52 = vshrl.u32 %v2792_v54, 16  ;;  %v1396_v55 = vpack.i.b16 %v2956_v20, %v2952_v19  ;;  %v1393_v54 = vpack.i.b16 %v1392_v31, %v1391_v21 }
  0xc5   : > { %v2944_v8 = vpop.permute.xlu0 %859  ;;  %v2946_v17 = vpop.permute.xlu1 %865  ;;  %v1770_v31 = vpack.i.b16 %v1769_v29, %v1768_v7  ;;  %v1757_v29 = vshrl.u32 %v2966_v36, 16 }
  0xc6   : > { %v2450_v35 = vcombine.low %v1396_v55, %v1396_v55  ;;  %v2449_v48 = vcombine.low %v1393_v54, %v1393_v54 }
  0xc8   : > { %1482 = vrot.lane.b32.xlu0 %v2457_v5, %s2630_s8  ;;  %1478 = vrot.lane.b32.xlu1 %v2456_v6, %s2629_s7  ;;  %v1755_v5 = vpack.i.b16 %v2966_v36, %v2962_v27  ;;  %v1752_v6 = vpack.i.b16 %v1751_v52, %v1750_v39  ;;  %v1295_v39 = vrot.slane %v1281_v9, %v2766_v28  ;;  %v1781_v52 = vshrl.u32 %v2912_v26, 16 }
  0xc9   : > { %v2976_v37 = vpop.permute.xlu0 %871  ;;  %v2978_v56 = vpop.permute.xlu1 %877  ;;  %v1428_v9 = vshrl.u32 %v1363_v60, 16  ;;  %v1398_v26 = vshrl.u32 %v2956_v20, 16  ;;  %v1403_v27 = vshrl.u32 %v1261_v59, 16  ;;  %v3032_v20 = vpack.i.b16 %v1757_v29, %v1756_v57 }
  0xca   : > { %v2471_v21 = vcombine.low %v1755_v5, %v1755_v5  ;;  %v2470_v50 = vcombine.low %v1752_v6, %v1752_v6  ;;  %v3016_v5 = vpack.i.b16 %v1363_v60, %v1329_v41  ;;  %v1427_v6 = vshrl.u32 %v1329_v41, 16 }
  0xcb   : > { %v1404_v36 = vshrl.u32 %v1295_v39, 16  ;;  %v3028_v16 = vcombine.high %v1295_v39, %v4077_v0  ;;  %v1782_v19 = vpack.i.b16 %v1781_v52, %v1780_v58  ;;  %v1439_v29 = vshrl.u32 %v2925_v46, 16 }
  0xcc   : > { %1845 = vrot.lane.b32.xlu0 %v2478_v30, %s2631_s9  ;;  %1841 = vrot.lane.b32.xlu1 %v2477_v45, %s2632_s10  ;;  %v1792_v30 = vshrl.u32 %v2835_v32, 16  ;;  %v1793_v45 = vshrl.u32 %v2839_v33, 16  ;;  %v1421_v32 = vshrl.u32 %v2886_v62, 16  ;;  %v1422_v33 = vshrl.u32 %v2890_v63, 16 }
  0xcd   : > { %v2996_v34 = vpop.permute.xlu0 %520  ;;  %v2998_v47 = vpop.permute.xlu1 %514  ;;  %v1331_v62 = vcombine.high %v1329_v41, %v4077_v0  ;;  %v1365_v63 = vcombine.high %v1363_v60, %v4077_v0  ;;  %v3038_v25 = vpack.i.b16 %v1428_v9, %v1427_v6 }
  0xce   : > { %v1794_v54 = vpack.i.b16 %v1793_v45, %v1792_v30  ;;  %v1423_v7 = vpack.i.b16 %v1422_v33, %v1421_v32  ;;  %v2468_v30 = vcombine.low %v1746_v61, %v1746_v61  ;;  %v2475_v45 = vcombine.low %v1770_v31, %v1770_v31 }
  0xcf   : > { %v3042_v58 = vpack.i.b16 %v1365_v63, %v1331_v62  ;;  %v2479_v61 = vcombine.low %v1782_v19, %v1782_v19  ;;  %v1434_v6 = vshrl.u32 %v1365_v63, 16  ;;  %v3086_v19 = vrot.slane %v2896_v14, %v2762_v18 }
  0xd0   : > { %1454 = vrot.lane.b32.xlu0 %v2450_v35, %s2630_s8  ;;  %1450 = vrot.lane.b32.xlu1 %v2449_v48, %s2629_s7  ;;  %v3030_v35 = vpack.i.b16 %v1295_v39, %v1261_v59  ;;  %v2482_v48 = vcombine.low %v1794_v54, %v1794_v54  ;;  %v3044_v39 = vpack.i.b16 %v1404_v36, %v1403_v27  ;;  %v1440_v54 = vshrl.u32 %v2922_v44, 16 }
  0xd1   : > { %v3012_v53 = vpop.permute.xlu0 %532  ;;  %v3014_v55 = vpop.permute.xlu1 %526  ;;  %v3048_v59 = vpack.i.b16 %v3028_v16, %v3025_v15  ;;  %v2458_v31 = vcombine.low %v1423_v7, %v1423_v7  ;;  %v1376_v36 = vcombine.high %v2925_v46, %v4077_v0  ;;  %v3082_v7 = vrot.slane %v2894_v13, %v2762_v18 }
  0xd2   : > { %v2452_v52 = vcombine.low %v3030_v35, %v3030_v35  ;;  %v3104_v13 = vrot.slane %v2946_v17, %v2762_v18 }
  0xd4   : > { %1817 = vrot.lane.b32.xlu0 %v2471_v21, %s2631_s9  ;;  %1813 = vrot.lane.b32.xlu1 %v2470_v50, %s2632_s10  ;;  %v2459_v21 = vcombine.low %v3016_v5, %v3016_v5  ;;  %v3036_v50 = vpack.i.b16 %v1398_v26, %v1397_v10  ;;  %v1433_v5 = vshrl.u32 %v1331_v62, 16  ;;  %v3060_v10 = vrot.slane %v2944_v8, %v2762_v18 }
  0xd5   : > { %v519_v41 = vpop.permute.xlu0 %518  ;;  %v513_v60 = vpop.permute.xlu1 %512  ;;  %v3064_v26 = vrot.slane %v2976_v37, %v2762_v18  ;;  %v1387_v37 = vcombine.high %v2922_v44, %v4077_v0  ;;  %v3110_v8 = vrot.slane %v2978_v56, %v2762_v18 }
  0xd6   : > { %v2451_v9 = vcombine.low %v3036_v50, %v3036_v50  ;;  %v1441_v50 = vpack.i.b16 %v1440_v54, %v1439_v29  ;;  %v543_v17 = vrot.slane %v513_v60, %v2762_v18  ;;  %v619_v60 = vrot.slane %v3014_v55, %v2762_v18 }
  0xd7   : > { %v899_v14 = vcombine.low %v3060_v10, %v3064_v26  ;;  %v1446_v56 = vshrl.u32 %v1387_v37, 16  ;;  %v3131_v27 = vpack.i.b16 %v1387_v37, %v1376_v36 }
  0xd8   : > { %1861 = vrot.lane.b32.xlu0 %v2482_v48, %s2633_s11  ;;  %1805 = vrot.lane.b32.xlu1 %v2468_v30, %s2633_s11  ;;  %v3094_v30 = vrot.slane %v2927_v49, %v2762_v18  ;;  %v645_v49 = vrot.slane %v2996_v34, %v2762_v18  ;;  %v2463_v62 = vcombine.low %v1441_v50, %v1441_v50 }
  0xd9   : > { %v531_v33 = vpop.permute.xlu0 %530  ;;  %v525_v57 = vpop.permute.xlu1 %524 }
  0xda   : > { %v551_v54 = vrot.slane %v525_v57, %v2762_v18  ;;  %v585_v34 = vrot.slane %v531_v33, %v2762_v18  ;;  %v3136_v33 = vrot.slane %v899_v14, %v2766_v28  ;;  %v968_v32 = vcombine.high %v3082_v7, %v3094_v30 }
  0xdc   : > { %1833 = vrot.lane.b32.xlu0 %v2475_v45, %s2633_s11  ;;  %1486 = vrot.lane.b32.xlu1 %v2458_v31, %s2633_s11  ;;  %v3098_v45 = vrot.slane %v2929_v51, %v2762_v18  ;;  %v3100_v31 = vpack.i.b16 %v1434_v6, %v1433_v5  ;;  %v653_v51 = vrot.slane %v3012_v53, %v2762_v18  ;;  %v1445_v5 = vshrl.u32 %v1376_v36, 16 }
  0xdd   : > { %v3088_v35 = vpop.permute.xlu0 %869  ;;  %v3090_v48 = vpop.permute.xlu1 %863  ;;  %v577_v6 = vrot.slane %v519_v41, %v2762_v18  ;;  %v611_v53 = vrot.slane %v2998_v47, %v2762_v18  ;;  %v553_v29 = vcombine.high %v543_v17, %v551_v54  ;;  %4096 = vst [vmem:[#allocation10_spill] sm:$0xff] %v3136_v33  ;;  %v933_v47 = vcombine.low %v3104_v13, %v3110_v8 }
  0xde   : > { %v1001_v57 = vcombine.low %v3086_v19, %v3098_v45  ;;  %v654_v0 = vcombine.low %v645_v49, %v653_v51  ;;  %v655_v50 = vcombine.high %v645_v49, %v653_v51  ;;  %v3143_v37 = vpack.i.b16 %v1446_v56, %v1445_v5 }
  0xdf   : > { %v587_v41 = vcombine.high %v577_v6, %v585_v34  ;;  %v621_v36 = vcombine.high %v611_v53, %v619_v60  ;;  %v1002_v14 = vcombine.high %v3086_v19, %v3098_v45  ;;  %v620_v46 = vcombine.low %v611_v53, %v619_v60 }
  0xe0   : > { %1490 = vrot.lane.b32.xlu0 %v2459_v21, %s2628_s6  ;;  %1849 = vrot.lane.b32.xlu1 %v2479_v61, %s2634_s17  ;;  %v967_v61 = vcombine.low %v3082_v7, %v3094_v30  ;;  %v3151_v44 = vrot.slane %v553_v29, %v2766_v28  ;;  %v3154_v55 = vrot.slane %v1001_v57, %v2766_v28  ;;  %v1044_v29 = vshrl.u32 %v3136_v33, 16 }
  0xe1   : > { %v882_v63 = vpop.permute.xlu0 %881  ;;  %v876_v21 = vpop.permute.xlu1 %875  ;;  %v586_v7 = vcombine.low %v577_v6, %v585_v34  ;;  %v3157_v30 = vrot.slane %v587_v41, %v2766_v28  ;;  %v552_v49 = vcombine.low %v543_v17, %v551_v54  ;;  %v4097_v51 = vcombine.low %v3032_v20, %v3032_v20 }
  0xe2   : > { %v3165_v19 = vrot.slane %v933_v47, %v2766_v28  ;;  %v3168_v45 = vrot.slane %v654_v0, %v2766_v28  ;;  %v4099_v5 = vmov 0   ;;  %v3176_v17 = vrot.slane %v655_v50, %v2766_v28 }
  0xe3   : > { %v3173_v56 = vcombine.high %v3136_v33, %v4099_v5  ;;  %v3179_v20 = vrot.slane %v621_v36, %v2766_v28  ;;  %v1021_v54 = vcombine.low %v3090_v48, %v876_v21  ;;  %v3184_v0 = vrot.slane %v620_v46, %v2766_v28 }
  0xe4   : > { %1462 = vrot.lane.b32.xlu0 %v2452_v52, %s2628_s6  ;;  %1458 = vrot.lane.b32.xlu1 %v2451_v9, %s2633_s11  ;;  %v3146_v9 = vrot.slane %v967_v61, %v2766_v28  ;;  %4098 = vst [vmem:[#allocation11_spill] sm:$0xff] %v3165_v19  ;;  %v569_v61 = vcombine.high %v3151_v44, %v4099_v5  ;;  %v1045_v48 = vshrl.u32 %v3165_v19, 16 }
  0xe5   : > { %v523_v24 = vpop.permute.xlu0 %522  ;;  %v517_v52 = vpop.permute.xlu1 %516  ;;  %v3189_v57 = vrot.slane %v586_v7, %v2766_v28  ;;  %v603_v41 = vcombine.high %v3157_v30, %v4099_v5  ;;  %v4100_v46 = vcombine.low %v3038_v25, %v3038_v25  ;;  %v3219_v25 = vrot.slane %v1021_v54, %v2766_v28 }
  0xe6   : > { %v3227_v7 = vcombine.high %v3165_v19, %v4099_v5  ;;  %v671_v54 = vcombine.high %v3176_v17, %v4099_v5  ;;  %v3254_v43 = vrot.slane %v968_v32, %v2766_v28 }
  0xe7   : > { %v3249_v50 = vpack.i.b16 %v603_v41, %v569_v61 }
  0xe8   : > { %1821 = vrot.lane.b32.xlu1 %v4097_v51, %s2634_s17  ;;  %1506 = vrot.lane.b32.xlu0 %v2463_v62, %s2629_s7  ;;  %v1032_v62 = vcombine.low %v3088_v35, %v882_v63  ;;  %v3194_v63 = vrot.slane %v552_v49, %v2766_v28  ;;  %v740_v33 = vshrl.u32 %v671_v54, 16 }
  0xe9   : > { %v535_v6 = vpop.permute.xlu0 %534  ;;  %v529_v34 = vpop.permute.xlu1 %528 }
  0xea   : > { %v685_v53 = vcombine.low %v523_v24, %v535_v6  ;;  %v674_v60 = vcombine.low %v517_v52, %v529_v34  ;;  %v4101_v24 = vcombine.low %v3042_v58, %v3042_v58  ;;  %v3216_v36 = vrot.slane %v1032_v62, %v2766_v28 }
  0xeb   : > { %v637_v52 = vcombine.high %v3179_v20, %v4099_v5  ;;  %v715_v62 = vshrl.u32 %v569_v61, 16  ;;  %v716_v58 = vshrl.u32 %v603_v41, 16 }
  0xec   : > { %1494 = vrot.lane.b32.xlu1 %v4100_v46, %s2632_s10  ;;  %1498 = vrot.lane.b32.xlu0 %v4101_v24, %s2631_s9  ;;  %v3208_v21 = vrot.slane %v685_v53, %v2766_v28  ;;  %v3211_v47 = vrot.slane %v674_v60, %v2766_v28  ;;  %v4102_v60 = vcombine.low %v3044_v39, %v3044_v39 }
  0xed   : > { %v739_v34 = vshrl.u32 %v637_v52, 16  ;;  %v4103_v46 = vcombine.low %v3048_v59, %v3048_v59  ;;  %v1046_v24 = vpack.i.b16 %v1045_v48, %v1044_v29  ;;  %v3251_v6 = vpack.i.b16 %v671_v54, %v637_v52 }
  0xee   : > { %v693_v49 = vcombine.high %v3208_v21, %v4099_v5  ;;  %v682_v51 = vcombine.high %v3211_v47, %v4099_v5  ;;  %v2465_v39 = vcombine.low %v3143_v37, %v3143_v37  ;;  %v2464_v59 = vcombine.low %v3131_v27, %v3131_v27 }
  0xef   : > { %v3260_v29 = vpack.i.b16 %v716_v58, %v715_v62  ;;  %v3263_v48 = vrot.slane %v1002_v14, %v2766_v28  ;;  %v3265_v61 = vpack.i.b16 %v740_v33, %v739_v34  ;;  %v2432_v32 = vcombine.low %v1046_v24, %v1046_v24 }
  0xf0   : > { %1466 = vrot.lane.b32.xlu1 %v4102_v60, %s2632_s10  ;;  %1470 = vrot.lane.b32.xlu0 %v4103_v46, %s2631_s9  ;;  %v3247_v35 = vpack.i.b16 %v693_v49, %v682_v51  ;;  %v751_v53 = vshrl.u32 %v682_v51, 16  ;;  %v752_v19 = vshrl.u32 %v693_v49, 16  ;;  %v1049_v27 = vpack.i.b16 %v3227_v7, %v3173_v56 }
  0xf1   : > { %v1068_v37 = vshrl.u32 %v3146_v9, 16  ;;  %v1069_v14 = vshrl.u32 %v3154_v55, 16  ;;  %v2462_v33 = vcombine.low %v3100_v31, %v3100_v31  ;;  %v4105_v58 = vshrl.u32 %v3028_v16, 16 }
  0xf2   : > { %v3267_v41 = vpack.i.b16 %v752_v19, %v751_v53  ;;  %v4104_v19 = vshrl.u32 %v3025_v15, 16  ;;  %v1079_v51 = vpack.i.b16 %v3263_v48, %v3254_v43  ;;  %v983_v62 = vcombine.high %v3146_v9, %v4099_v5 }
  0xf3   : > { %v1017_v54 = vcombine.high %v3154_v55, %v4099_v5  ;;  %v2433_v34 = vcombine.low %v1049_v27, %v1049_v27  ;;  %v1070_v31 = vpack.i.b16 %v1069_v14, %v1068_v37  ;;  %v721_v15 = vshrl.u32 %v3184_v0, 16 }
  0xf4   : > { %1514 = vrot.lane.b32.xlu0 %v2465_v39, %s2633_s11  ;;  %1510 = vrot.lane.b32.xlu1 %v2464_v59, %s2630_s8  ;;  %v1411_v49 = vpack.i.b16 %v4105_v58, %v4104_v19  ;;  %v722_v16 = vshrl.u32 %v3168_v45, 16  ;;  %v2442_v24 = vcombine.low %v1079_v51, %v1079_v51  ;;  %v1080_v59 = vshrl.u32 %v3254_v43, 16 }
  0xf5   : > { %v1073_v60 = vpack.i.b16 %v1017_v54, %v983_v62  ;;  %v2439_v46 = vcombine.low %v1070_v31, %v1070_v31  ;;  %v934_v27 = vcombine.high %v3104_v13, %v3110_v8  ;;  %v1074_v37 = vshrl.u32 %v983_v62, 16 }
  0xf6   : > { %v2455_v53 = vcombine.low %v1411_v49, %v1411_v49  ;;  %v723_v39 = vpack.i.b16 %v722_v16, %v721_v15  ;;  %v1075_v14 = vshrl.u32 %v1017_v54, 16  ;;  %v1050_v19 = vshrl.u32 %v3173_v56, 16 }
  0xf7   : > { %v1051_v58 = vshrl.u32 %v3227_v7, 16  ;;  %v697_v49 = vshrl.u32 %v3194_v63, 16  ;;  %v698_v51 = vshrl.u32 %v3189_v57, 16 }
  0xf8   : > { %1502 = vrot.lane.b32.xlu1 %v2462_v33, %s2634_s17  ;;  %1103 = vrot.lane.b32.xlu0 %v2432_v32, %s2629_s7  ;;  %v1081_v33 = vshrl.u32 %v3263_v48, 16  ;;  %v900_v32 = vcombine.high %v3060_v10, %v3064_v26  ;;  %v2422_v31 = vcombine.low %v723_v39, %v723_v39  ;;  %v948_v26 = vrot.slane %v934_v27, %v2766_v28 }
  0xf9   : > { %v1076_v8 = vpack.i.b16 %v1075_v14, %v1074_v37  ;;  %v1052_v62 = vpack.i.b16 %v1051_v58, %v1050_v19  ;;  %v699_v56 = vpack.i.b16 %v698_v51, %v697_v49  ;;  %v1029_v39 = vcombine.high %v3219_v25, %v4099_v5 }
  0xfa   : > { %v914_v10 = vrot.slane %v900_v32, %v2766_v28  ;;  %v1082_v13 = vpack.i.b16 %v1081_v33, %v1080_v59  ;;  %v1057_v16 = vshrl.u32 %v948_v26, 16  ;;  %v1040_v59 = vcombine.high %v3216_v36, %v4099_v5 }
  0xfb   : > { %v2441_v7 = vcombine.low %v1076_v8, %v1076_v8  ;;  %v568_v27 = vcombine.high %v3194_v63, %v4099_v5  ;;  %v602_v37 = vcombine.high %v3189_v57, %v4099_v5  ;;  %v3327_v58 = vrot.slane %v2715_v1, %v2762_v18 }
  0xfc   : > { %1474 = vrot.lane.b32.xlu1 %v2455_v53, %s2634_s17  ;;  %1107 = vrot.lane.b32.xlu0 %v2433_v34, %s2630_s8  ;;  %v2440_v34 = vcombine.low %v1073_v60, %v1073_v60  ;;  %v2443_v54 = vcombine.low %v1082_v13, %v1082_v13  ;;  %v1056_v15 = vshrl.u32 %v914_v10, 16  ;;  %v2434_v53 = vcombine.low %v1052_v62, %v1052_v62 }
  0xfd   : > { %v1092_v60 = vshrl.u32 %v3219_v25, 16  ;;  %v1055_v33 = vpack.i.b16 %v948_v26, %v914_v10  ;;  %v1097_v19 = vpack.i.b16 %v1040_v59, %v1029_v39  ;;  %v3331_v49 = vrot.slane %v2718_v2, %v2762_v18 }
  0xfe   : > { %v1058_v32 = vpack.i.b16 %v1057_v16, %v1056_v15  ;;  %v3335_v51 = vrot.slane %v2725_v3, %v2762_v18  ;;  %v636_v13 = vcombine.high %v3184_v0, %v4099_v5  ;;  %v670_v1 = vcombine.high %v3168_v45, %v4099_v5 }
  0xff   : > { %v261_v2 = vcombine.high %v3331_v49, %v3327_v58  ;;  %v702_v62 = vpack.i.b16 %v602_v37, %v568_v27  ;;  %v950_v15 = vcombine.high %v948_v26, %v4099_v5 }
 0x100   : > { %1131 = vrot.lane.b32.xlu1 %v2439_v46, %s2629_s7  ;;  %1143 = vrot.lane.b32.xlu0 %v2442_v24, %s2628_s6  ;;  %v2415_v46 = vcombine.low %v699_v56, %v699_v56  ;;  %v1093_v24 = vshrl.u32 %v3216_v36, 16  ;;  %v2436_v8 = vcombine.low %v1058_v32, %v1058_v32  ;;  %v984_v56 = vcombine.high %v3254_v43, %v4099_v5 }
 0x101   : > { %v726_v16 = vpack.i.b16 %v670_v1, %v636_v13 }
 0x102   : > { %v1094_v14 = vpack.i.b16 %v1093_v24, %v1092_v60  ;;  %v1099_v60 = vshrl.u32 %v1040_v59, 16  ;;  %v275_v24 = vrot.slane %v261_v2, %v2766_v28 }
 0x104   : > { %1135 = vrot.lane.b32.xlu1 %v2440_v34, %s2630_s8  ;;  %784 = vrot.lane.b32.xlu0 %v2422_v31, %s2629_s7  ;;  %v3339_v34 = vrot.slane %v2728_v4, %v2762_v18  ;;  %v2435_v31 = vcombine.low %v1055_v33, %v1055_v33  ;;  %v2446_v4 = vcombine.low %v1094_v14, %v1094_v14  ;;  %v727_v14 = vshrl.u32 %v636_v13, 16 }
 0x105   : > { %v2447_v18 = vcombine.low %v1097_v19, %v1097_v19  ;;  %v2423_v19 = vcombine.low %v726_v16, %v726_v16  ;;  %v1063_v16 = vshrl.u32 %v950_v15, 16 }
 0x106   : > { %v293_v3 = vcombine.high %v3339_v34, %v3335_v51 }
 0x108   : > { %1139 = vrot.lane.b32.xlu1 %v2441_v7, %s2633_s11  ;;  %1147 = vrot.lane.b32.xlu0 %v2443_v54, %s2632_s10  ;;  %v1018_v7 = vcombine.high %v3263_v48, %v4099_v5  ;;  %v916_v54 = vcombine.high %v914_v10, %v4099_v5  ;;  %v307_v33 = vrot.slane %v293_v3, %v2766_v28  ;;  %v728_v48 = vshrl.u32 %v670_v1, 16 }
 0x109   : > { %v703_v3 = vshrl.u32 %v568_v27, 16  ;;  %v732_v27 = vpack.i.b16 %v3176_v17, %v3179_v20 }
 0x10a   : > { %v1085_v43 = vpack.i.b16 %v1018_v7, %v984_v56  ;;  %v1061_v32 = vpack.i.b16 %v950_v15, %v916_v54  ;;  %v3361_v10 = vpack.i.b16 %v307_v33, %v275_v24  ;;  %v368_v59 = vshrl.u32 %v307_v33, 16 }
 0x10b   : > { %v1062_v1 = vshrl.u32 %v916_v54, 16  ;;  %v277_v54 = vcombine.high %v275_v24, %v4099_v5  ;;  %v309_v15 = vcombine.high %v307_v33, %v4099_v5  ;;  %v710_v33 = vshrl.u32 %v3157_v30, 16 }
 0x10c   : > { %1111 = vrot.lane.b32.xlu1 %v2434_v53, %s2633_s11  ;;  %756 = vrot.lane.b32.xlu0 %v2415_v46, %s2629_s7  ;;  %v2416_v53 = vcombine.low %v702_v62, %v702_v62  ;;  %v1098_v46 = vshrl.u32 %v1029_v39, 16  ;;  %v367_v39 = vshrl.u32 %v275_v24, 16  ;;  %v2444_v62 = vcombine.low %v1085_v43, %v1085_v43 }
 0x10d   : > { %v2437_v2 = vcombine.low %v1061_v32, %v1061_v32  ;;  %v709_v24 = vshrl.u32 %v3151_v44, 16 }
 0x10e   : > { %v1100_v26 = vpack.i.b16 %v1099_v60, %v1098_v46  ;;  %v3365_v52 = vpack.i.b16 %v368_v59, %v367_v39  ;;  %v373_v39 = vshrl.u32 %v277_v54, 16  ;;  %v1838_v59 = vpop.permute.xlu0 %1837 }
 0x110   : > { %1115 = vrot.lane.b32.xlu1 %v2435_v31, %s2628_s6  ;;  %1119 = vrot.lane.b32.xlu0 %v2436_v8, %s2632_s10  ;;  %v1086_v31 = vshrl.u32 %v984_v56, 16  ;;  %v1087_v8 = vshrl.u32 %v1018_v7, 16  ;;  %v2448_v13 = vcombine.low %v1100_v26, %v1100_v26  ;;  %v733_v56 = vshrl.u32 %v3179_v20, 16 }
 0x111   : > { %v734_v7 = vshrl.u32 %v3176_v17, 16  ;;  %v708_v26 = vpack.i.b16 %v3157_v30, %v3151_v44  ;;  %v374_v20 = vshrl.u32 %v309_v15, 16  ;;  %v746_v17 = vshrl.u32 %v3208_v21, 16 }
 0x112   : > { %v1088_v46 = vpack.i.b16 %v1087_v8, %v1086_v31  ;;  %v745_v31 = vshrl.u32 %v3211_v47, 16  ;;  %v3391_v30 = vpack.i.b16 %v309_v15, %v277_v54  ;;  %v4106_v15 = vpack.i.b16 %v2823_v22, %v2826_v23 }
 0x113   : > { %v3385_v8 = vpack.i.b16 %v374_v20, %v373_v39 }
 0x114   : > { %1159 = vrot.lane.b32.xlu1 %v2446_v4, %s2629_s7  ;;  %1163 = vrot.lane.b32.xlu0 %v2447_v18, %s2630_s8  ;;  %v729_v4 = vpack.i.b16 %v728_v48, %v727_v14  ;;  %v704_v18 = vshrl.u32 %v602_v37, 16  ;;  %v1064_v37 = vpack.i.b16 %v1063_v16, %v1062_v1  ;;  %v2445_v43 = vcombine.low %v1088_v46, %v1088_v46 }
 0x115   : > { %v2425_v14 = vcombine.low %v732_v27, %v732_v27 }
 0x116   : > { %v705_v60 = vpack.i.b16 %v704_v18, %v703_v3  ;;  %v2438_v48 = vcombine.low %v1064_v37, %v1064_v37  ;;  %v711_v3 = vpack.i.b16 %v710_v33, %v709_v24  ;;  %v747_v18 = vpack.i.b16 %v746_v17, %v745_v31 }
 0x117   : > { %v4107_v24 = vpack.i.b16 %v2774_v38, %v2780_v40 }
 0x118   : > { %788 = vrot.lane.b32.xlu1 %v2423_v19, %s2630_s8  ;;  %760 = vrot.lane.b32.xlu0 %v2416_v53, %s2630_s8  ;;  %v2424_v53 = vcombine.low %v729_v4, %v729_v4  ;;  %v2417_v32 = vcombine.low %v705_v60, %v705_v60  ;;  %v735_v19 = vpack.i.b16 %v734_v7, %v733_v56 }
 0x119   : > { %v2418_v4 = vcombine.low %v708_v26, %v708_v26  ;;  %v2419_v44 = vcombine.low %v711_v3, %v711_v3  ;;  %v2429_v16 = vcombine.low %v747_v18, %v747_v18  ;;  %v4108_v3 = vpack.i.b16 %v2807_v11, %v2810_v12 }
 0x11c   : > { %1151 = vrot.lane.b32.xlu1 %v2444_v62, %s2631_s9  ;;  %1123 = vrot.lane.b32.xlu0 %v2437_v2, %s2631_s9  ;;  %v1810_v62 = vpop.permute.xlu0 %1809  ;;  %v2426_v2 = vcombine.low %v735_v19, %v735_v19 }
 0x120   : > { %792 = vrot.lane.b32.xlu1 %v2424_v53, %s2633_s11  ;;  %1167 = vrot.lane.b32.xlu0 %v2448_v13, %s2633_s11 }
 0x124   : > { %1155 = vrot.lane.b32.xlu1 %v2445_v43, %s2634_s17  ;;  %764 = vrot.lane.b32.xlu0 %v2417_v32, %s2633_s11 }
 0x128   : > { %796 = vrot.lane.b32.xlu1 %v2425_v14, %s2628_s6  ;;  %1127 = vrot.lane.b32.xlu0 %v2438_v48, %s2634_s17 }
 0x12c   : > { %800 = vrot.lane.b32.xlu1 %v2426_v2, %s2632_s10  ;;  %768 = vrot.lane.b32.xlu0 %v2418_v4, %s2628_s6 }
 0x12e   : > { %v1858_v13 = vpop.permute.xlu1 %1857  ;;  %v1854_v1 = vpop.permute.xlu0 %1853 }
 0x12f   : > { %v1895_v19 = vsel %vm456_vm0, %v4106_v15, %v1854_v1 }
 0x130   : > { %772 = vrot.lane.b32.xlu1 %v2419_v44, %s2632_s10  ;;  %812 = vrot.lane.b32.xlu0 %v2429_v16, %s2629_s7  ;;  %v1897_v39 = vsel %vm460_vm1, %v1895_v19, %v1858_v13 }
 0x132   : > { %v1798_v53 = vpop.permute.xlu1 %1797  ;;  %v1826_v46 = vpop.permute.xlu0 %1825 }
 0x133   : > { %v1880_v22 = vsel %vm456_vm0, %v4107_v24, %v1826_v46  ;;  %v1865_v18 = vsel %vm456_vm0, %v4108_v3, %v1798_v53  ;;  %v4112_v3 = vld [vmem:[#allocation9_spill] sm:$0xff] }
 0x136   : > { %v1802_v60 = vpop.permute.xlu1 %1801  ;;  %v1830_v27 = vpop.permute.xlu0 %1829 }
 0x137   : > { %v1882_v23 = vsel %vm460_vm1, %v1880_v22, %v1830_v27  ;;  %v1867_v38 = vsel %vm460_vm1, %v1865_v18, %v1802_v60 }
 0x13a   : > { %v1479_v37 = vpop.permute.xlu1 %1478  ;;  %v1483_v56 = vpop.permute.xlu0 %1482 }
 0x13e   : > { %v1842_v7 = vpop.permute.xlu1 %1841  ;;  %v1846_v43 = vpop.permute.xlu0 %1845 }
 0x142   : > { %v3395_v32 = vpop.permute.xlu1 %1450  ;;  %v3397_v14 = vpop.permute.xlu0 %1454 }
 0x146   : > { %v1814_v48 = vpop.permute.xlu1 %1813  ;;  %v1818_v54 = vpop.permute.xlu0 %1817 }
 0x14a   : > { %v1806_v26 = vpop.permute.xlu1 %1805  ;;  %v1862_v20 = vpop.permute.xlu0 %1861 }
 0x14b   : > { %v3405_v17 = vsel %vm463_vm2, %v1897_v39, %v1862_v20  ;;  %v1869_v1 = vsel %vm463_vm2, %v1867_v38, %v1806_v26  ;;  %v4109_v39 = vld [vmem:[#allocation5_spill] sm:$0xff] }
 0x14c   : > { %v2162_v31 = vrot.slane %v3405_v17, 2  ;;  %2175 = vrot.lane.b32.xlu1 %v3405_v17, %s2632_s10  ;;  %v2151_v33 = vrot.slane %v3405_v17, 4  ;;  %v1871_v46 = vsel %vm466_vm3, %v1869_v1, %v1810_v62  ;;  %v4110_v20 = vpack.i.b16 %v2853_v42, %v4109_v39 }
 0x14d   : > { %v1873_v27 = vsel %vm469_vm4, %v1871_v46, %v1814_v48 }
 0x14e   : > { %v1487_v2 = vpop.permute.xlu1 %1486  ;;  %2167 = vrot.lane.b32.xlu0 %v2162_v31, %s2631_s9  ;;  %v1834_v4 = vpop.permute.xlu0 %1833  ;;  %v1533_v48 = vsel %vm456_vm0, %v4110_v20, %v1479_v37 }
 0x14f   : > { %v1884_v13 = vsel %vm463_vm2, %v1882_v23, %v1834_v4  ;;  %v1535_v22 = vsel %vm460_vm1, %v1533_v48, %v1483_v56  ;;  %v4111_v4 = vld [vmem:[#allocation8_spill] sm:$0xff] }
 0x150   : > { %v1886_v40 = vsel %vm466_vm3, %v1884_v13, %v1838_v59  ;;  %2156 = vrot.lane.b32.xlu1 %v2151_v33, %s2634_s17  ;;  %v1537_v23 = vsel %vm463_vm2, %v1535_v22, %v1487_v2  ;;  %v4113_v18 = vpack.i.b16 %v4111_v4, %v4112_v3 }
 0x151   : > { %v1888_v44 = vsel %vm469_vm4, %v1886_v40, %v1842_v7  ;;  %v1875_v7 = vsel %vm472_vm6, %v1873_v27, %v1818_v54 }
 0x152   : > { %v1850_v16 = vpop.permute.xlu1 %1849  ;;  %v1890_v11 = vsel %vm472_vm6, %v1888_v44, %v1846_v43  ;;  %v1491_v12 = vpop.permute.xlu0 %1490  ;;  %v260_v44 = vcombine.low %v3331_v49, %v3327_v58  ;;  %v3488_v49 = vld.sshfl [vmem:[%s2712_s28] sm:$0x33 pattern:$0x76325410] }
 0x153   : > { %v3429_v53 = vsel %vm475_vm5, %v1890_v11, %v1850_v16  ;;  %v1539_v33 = vsel %vm466_vm3, %v1537_v23, %v1491_v12  ;;  %v292_v16 = vcombine.low %v3339_v34, %v3335_v51  ;;  %v3491_v51 = vld.sshfl [vmem:[%s2712_s28 + $0x18] sm:$0x33 pattern:$0x76325410]  ;;  %v4114_v23 = vld [vmem:[#allocation6_spill] sm:$0xff] }
 0x154   : > { %2173 = vrot.lane.b32.xlu0 %v3429_v53, %s2632_s10  ;;  %v2150_v54 = vrot.slane %v3429_v53, 4  ;;  %v196_v22 = vcombine.low %v3488_v49, %v3491_v51 }
 0x155   : > { %v3500_v39 = vrot.slane %v292_v16, %v2766_v28 }
 0x156   : > { %v1459_v59 = vpop.permute.xlu1 %1458  ;;  %v3434_v60 = vpop.permute.xlu0 %1462  ;;  %v3534_v16 = vrot.slane %v196_v22, %v2766_v28 }
 0x158   : > { %4117 = vst [vmem:[#allocation5_spill] sm:$0xff] %v3534_v16 }
 0x15a   : > { %v1822_v15 = vpop.permute.xlu1 %1821  ;;  %v1507_v19 = vpop.permute.xlu0 %1506 }
 0x15b   : > { %v3439_v43 = vsel %vm475_vm5, %v1875_v7, %v1822_v15  ;;  %v1548_v42 = vsel %vm456_vm0, %v4113_v18, %v1507_v19  ;;  %v3481_v7 = vld.sshfl [vmem:[%s2712_s28 + $0xc] sm:$0x33 pattern:$0x76325410] }
 0x15c   : > { %2171 = vrot.lane.b32.xlu0 %v3439_v43, %s2632_s10  ;;  %v2149_v38 = vrot.slane %v3439_v43, 4  ;;  %v3484_v19 = vld.sshfl [vmem:[%s2712_s28 + $0x24] sm:$0x33 pattern:$0x76325410] }
 0x15d   : > { %v228_v48 = vcombine.low %v3481_v7, %v3484_v19 }
 0x15e   : > { %v1495_v26 = vpop.permute.xlu1 %1494  ;;  %v1499_v62 = vpop.permute.xlu0 %1498 }
 0x15f   : > { %v1541_v40 = vsel %vm469_vm4, %v1539_v33, %v1495_v26  ;;  %v4115_v33 = vld [vmem:[#allocation7_spill] sm:$0xff] }
 0x160   : > { %2139 = vrot.lane.b32.xlu0 %v3439_v43, %s2629_s7  ;;  %v1543_v11 = vsel %vm472_vm6, %v1541_v40, %v1499_v62  ;;  %v3497_v62 = vrot.slane %v260_v44, %v2766_v28  ;;  %v4116_v4 = vpack.i.b16 %v4114_v23, %v4115_v33 }
 0x162   : > { %v1467_v31 = vpop.permute.xlu1 %1466  ;;  %v3449_v24 = vpop.permute.xlu0 %1470  ;;  %v1518_v3 = vsel %vm456_vm0, %v4116_v4, %v3395_v32  ;;  %v276_v4 = vcombine.high %v3497_v62, %v4099_v5 }
 0x163   : > { %v1520_v40 = vsel %vm460_vm1, %v1518_v3, %v3397_v14  ;;  %v2427_v14 = vcombine.low %v3251_v6, %v3251_v6  ;;  %v308_v3 = vcombine.high %v3500_v39, %v4099_v5 }
 0x164   : > { %2154 = vrot.lane.b32.xlu0 %v2150_v54, %s2634_s17 }
 0x166   : > { %v1511_v13 = vpop.permute.xlu1 %1510  ;;  %v1515_v37 = vpop.permute.xlu0 %1514 }
 0x167   : > { %v1550_v56 = vsel %vm460_vm1, %v1548_v42, %v1511_v13  ;;  %v355_v13 = vshrl.u32 %v3497_v62, 16 }
 0x168   : > { %v3464_v2 = vsel %vm463_vm2, %v1550_v56, %v1515_v37  ;;  %2152 = vrot.lane.b32.xlu0 %v2149_v38, %s2634_s17  ;;  %v356_v37 = vshrl.u32 %v3500_v39, 16  ;;  %v1522_v56 = vsel %vm463_vm2, %v1520_v40, %v1459_v59 }
 0x169   : > { %v2108_v1 = vrot.slane %v3464_v2, 6  ;;  %v2119_v58 = vrot.slane %v3464_v2, 4  ;;  %v2128_v54 = vrot.slane %v3464_v2, 2  ;;  %v1524_v59 = vsel %vm466_vm3, %v1522_v56, %v3434_v60 }
 0x16a   : > { %v1503_v12 = vpop.permute.xlu1 %1502  ;;  %v3473_v46 = vpop.permute.xlu0 %1103  ;;  %v357_v44 = vpack.i.b16 %v356_v37, %v355_v13  ;;  %v2160_v60 = vrot.slane %v3439_v43, 2  ;;  %v361_v56 = vshrl.u32 %v276_v4, 16 }
 0x16b   : > { %v3476_v27 = vsel %vm475_vm5, %v1543_v11, %v1503_v12  ;;  %2113 = vrot.lane.b32.xlu1 %v2108_v1, %s2634_s17  ;;  %v3537_v11 = vrot.slane %v228_v48, %v2766_v28  ;;  %v2161_v12 = vrot.slane %v3429_v53, 2  ;;  %v331_v48 = vshrl.u32 %v3534_v16, 16 }
 0x16c   : > { %v2107_v15 = vrot.slane %v3476_v27, 6  ;;  %v2118_v20 = vrot.slane %v3476_v27, 4  ;;  %v4086_v38 = vrot.slane %v3476_v27, 2 }
 0x16d   : > { %4118 = vst [vmem:[#allocation8_spill] sm:$0xff] %v3537_v11 }
 0x16e   : > { %v1475_v34 = vpop.permute.xlu1 %1474  ;;  %2111 = vrot.lane.b32.xlu0 %v2107_v15, %s2634_s17  ;;  %v3494_v26 = vpop.permute.xlu0 %1107  ;;  %v1526_v15 = vsel %vm469_vm4, %v1524_v59, %v1467_v31 }
 0x16f   : > { %2124 = vrot.lane.b32.xlu1 %v2119_v58, %s2631_s9  ;;  %v1528_v6 = vsel %vm472_vm6, %v1526_v15, %v3449_v24  ;;  %v2428_v24 = vcombine.low %v3265_v61, %v3265_v61  ;;  %v229_v61 = vcombine.high %v3481_v7, %v3484_v19  ;;  %v2421_v7 = vcombine.low %v3260_v29, %v3260_v29  ;;  %v2553_v19 = vld [vmem:[%s2712_s28 + $0x8] sm:$0x3] }
 0x170   : > { %v3559_v31 = vsel %vm475_vm5, %v1528_v6, %v1475_v34 }
 0x171   : > { %v2106_v13 = vrot.slane %v3559_v31, 6  ;;  %v2117_v59 = vrot.slane %v3559_v31, 4 }
 0x172   : > { %v3514_v18 = vpop.permute.xlu1 %1131  ;;  %2122 = vrot.lane.b32.xlu0 %v2118_v20, %s2631_s9  ;;  %v3517_v42 = vpop.permute.xlu0 %1143  ;;  %v2405_v20 = vcombine.low %v357_v44, %v357_v44  ;;  %v362_v44 = vshrl.u32 %v308_v3, 16 }
 0x173   : > { %2133 = vrot.lane.b32.xlu1 %v2128_v54, %s2632_s10  ;;  %v332_v54 = vshrl.u32 %v3537_v11, 16 }
 0x174   : > { %v363_v15 = vpack.i.b16 %v362_v44, %v361_v56  ;;  %v2430_v44 = vcombine.low %v3247_v35, %v3247_v35 }
 0x175   : > { %v333_v33 = vpack.i.b16 %v332_v54, %v331_v48  ;;  %v2552_v48 = vld [vmem:[%s2712_s28 + $0x2c] sm:$0x3] }
 0x176   : > { %v3526_v32 = vpop.permute.xlu1 %1135  ;;  %2131 = vrot.lane.b32.xlu0 %v4086_v38, %s2632_s10  ;;  %v3531_v1 = vpop.permute.xlu0 %784 }
 0x177   : > { %2141 = vrot.lane.b32.xlu1 %v3429_v53, %s2629_s7  ;;  %v2398_v40 = vcombine.low %v333_v33, %v333_v33 }
 0x17a   : > { %804 = vrot.lane.b32.xlu0 %v2427_v14, %s2631_s9  ;;  %v3548_v58 = vpop.permute.xlu0 %1147  ;;  %v3553_v22 = vpop.permute.xlu1 %1139  ;;  %v197_v14 = vcombine.high %v3488_v49, %v3491_v51  ;;  %v4085_v51 = vrot.slane %v3559_v31, 2 }
 0x17b   : > { %2165 = vrot.lane.b32.xlu1 %v2161_v12, %s2631_s9 }
 0x17c   : > { %v211_v33 = vrot.slane %v197_v14, %v2766_v28 }
 0x17e   : > { %418 = vrot.lane.b32.xlu0 %v2405_v20, %s2629_s7  ;;  %v757_v23 = vpop.permute.xlu0 %756  ;;  %v3570_v34 = vpop.permute.xlu1 %1111  ;;  %v2551_v20 = vld [vmem:[%s2712_s28 + $0x14] sm:$0x3]  ;;  %v343_v14 = vshrl.u32 %v211_v33, 16 }
 0x17f   : > { %2163 = vrot.lane.b32.xlu1 %v2160_v60, %s2631_s9  ;;  %v319_v54 = vcombine.low %v2551_v20, %v2552_v48  ;;  %v2554_v60 = vld [vmem:[%s2712_s28 + $0x20] sm:$0x3]  ;;  %s2488_s28 = sshll.u32 %s2677_s16, 8  ;;  %s2319_s16 = scalar_lea.sflag [#allocation3], %s161_s26 }
 0x180   : > { %v310_v49 = vcombine.low %v2553_v19, %v2554_v60  ;;  %v360_v19 = vpack.i.b16 %v308_v3, %v276_v4  ;;  %v244_v60 = vcombine.high %v3537_v11, %v4099_v5 }
 0x181   : > { %v3601_v56 = vrot.slane %v319_v54, %v2766_v28 }
 0x182   : > { %808 = vrot.lane.b32.xlu0 %v2428_v24, %s2634_s17  ;;  %v3573_v37 = vpop.permute.xlu0 %1119  ;;  %v3587_v6 = vpop.permute.xlu1 %1115  ;;  %v243_v24 = vrot.slane %v229_v61, %v2766_v28  ;;  %v3604_v29 = vrot.slane %v310_v49, %v2766_v28  ;;  %v2420_v28 = vcombine.low %v3249_v50, %v3249_v50  ;;  %v212_v50 = vcombine.high %v3534_v16, %v4099_v5 }
 0x183   : > { %2109 = vrot.lane.b32.xlu1 %v2106_v13, %s2634_s17  ;;  %v3624_v54 = vcombine.high %v3601_v56, %v4099_v5 }
 0x184   : > { %v3620_v35 = vcombine.high %v3604_v29, %v4099_v5  ;;  %v337_v3 = vshrl.u32 %v212_v50, 16 }
 0x186   : > { %v3581_v12 = vpop.permute.xlu0 %1163  ;;  %390 = vrot.lane.b32.xlu0 %v2398_v40, %s2629_s7  ;;  %v2407_v40 = vcombine.low %v363_v15, %v363_v15  ;;  %v3608_v61 = vpop.permute.xlu1 %1159  ;;  %v2408_v15 = vcombine.low %v3361_v10, %v3361_v10  ;;  %v2409_v10 = vcombine.low %v3365_v52, %v3365_v52  ;;  %v384_v4 = vpack.i.b16 %v3624_v54, %v3620_v35 }
 0x187   : > { %2120 = vrot.lane.b32.xlu1 %v2117_v59, %s2631_s9  ;;  %v344_v59 = vshrl.u32 %v243_v24, 16 }
 0x189   : > { %v345_v48 = vpack.i.b16 %v344_v59, %v343_v14 }
 0x18a   : > { %v761_v13 = vpop.permute.xlu0 %760  ;;  %780 = vrot.lane.b32.xlu0 %v2421_v7, %s2634_s17  ;;  %v3636_v49 = vpop.permute.xlu1 %788 }
 0x18b   : > { %2129 = vrot.lane.b32.xlu1 %v4085_v51, %s2632_s10  ;;  %v2402_v52 = vcombine.low %v345_v48, %v345_v48  ;;  %v213_v51 = vcombine.high %v211_v33, %v4099_v5 }
 0x18e   : > { %v3610_v20 = vpop.permute.xlu0 %1123  ;;  %426 = vrot.lane.b32.xlu0 %v2407_v40, %s2633_s11  ;;  %v2431_v40 = vcombine.low %v3267_v41, %v3267_v41  ;;  %v245_v41 = vcombine.high %v243_v24, %v4099_v5 }
 0x18f   : > { %816 = vrot.lane.b32.xlu1 %v2430_v44, %s2630_s8  ;;  %v4119_v44 = vpack.i.b16 %v3189_v57, %v3194_v63  ;;  %v2406_v57 = vcombine.low %v360_v19, %v360_v19  ;;  %v336_v63 = vpack.i.b16 %v244_v60, %v212_v50  ;;  %v342_v50 = vpack.i.b16 %v243_v24, %v211_v33 }
 0x190   : > { %v350_v11 = vshrl.u32 %v245_v41, 16 }
 0x191   : > { %v824_v14 = vsel %vm456_vm0, %v4119_v44, %v757_v23  ;;  %v1152_v23 = vpop.permute.xlu1 %1151  ;;  %v2413_v44 = vcombine.low %v384_v4, %v384_v4 }
 0x192   : > { %v3626_v7 = vpop.permute.xlu0 %1167  ;;  %430 = vrot.lane.b32.xlu0 %v2408_v15, %s2628_s6  ;;  %v826_v59 = vsel %vm460_vm1, %v824_v14, %v761_v13  ;;  %v349_v14 = vshrl.u32 %v213_v51, 16 }
 0x193   : > { %776 = vrot.lane.b32.xlu1 %v2420_v28, %s2631_s9  ;;  %v338_v28 = vshrl.u32 %v244_v60, 16  ;;  %v4120_v60 = vpack.i.b16 %v3154_v55, %v3146_v9 }
 0x194   : > { %v351_v19 = vpack.i.b16 %v350_v11, %v349_v14 }
 0x195   : > { %v339_v13 = vpack.i.b16 %v338_v28, %v337_v3  ;;  %v379_v3 = vshrl.u32 %v3604_v29, 16  ;;  %v3670_v11 = vpop.permute.xlu1 %792  ;;  %v4122_v28 = vld [vmem:[#allocation11_spill] sm:$0xff] }
 0x196   : > { %v765_v15 = vpop.permute.xlu0 %764  ;;  %434 = vrot.lane.b32.xlu0 %v2409_v10, %s2632_s10  ;;  %v2399_v10 = vcombine.low %v336_v63, %v336_v63  ;;  %v2404_v9 = vcombine.low %v351_v19, %v351_v19  ;;  %v4125_v19 = vpack.i.b16 %v3216_v36, %v3219_v25 }
 0x197   : > { %v828_v38 = vsel %vm463_vm2, %v826_v59, %v765_v15  ;;  %820 = vrot.lane.b32.xlu1 %v2431_v40, %s2633_s11  ;;  %v2411_v59 = vcombine.low %v3385_v8, %v3385_v8  ;;  %v2400_v40 = vcombine.low %v339_v13, %v339_v13  ;;  %v380_v15 = vshrl.u32 %v3601_v56, 16 }
 0x199   : > { %v381_v24 = vpack.i.b16 %v380_v15, %v379_v3 }
 0x19a   : > { %v1128_v48 = vpop.permute.xlu0 %1127  ;;  %406 = vrot.lane.b32.xlu0 %v2402_v52, %s2632_s10  ;;  %v1186_v52 = vsel %vm456_vm0, %v4120_v60, %v3514_v18  ;;  %v4121_v18 = vpack.i.b16 %v3208_v21, %v3211_v47  ;;  %v1156_v21 = vpop.permute.xlu1 %1155 }
 0x19b   : > { %422 = vrot.lane.b32.xlu1 %v2406_v57, %s2630_s8  ;;  %v1188_v8 = vsel %vm460_vm1, %v1186_v52, %v3526_v32 }
 0x19c   : > { %v1190_v33 = vsel %vm463_vm2, %v1188_v8, %v3553_v22  ;;  %v4123_v22 = vld [vmem:[#allocation10_spill] sm:$0xff] }
 0x19d   : > { %v1192_v32 = vsel %vm466_vm3, %v1190_v33, %v3517_v42  ;;  %v4124_v57 = vpack.i.b16 %v4122_v28, %v4123_v22  ;;  %v2412_v42 = vcombine.low %v381_v24, %v381_v24 }
 0x19e   : > { %v769_v16 = vpop.permute.xlu0 %768  ;;  %450 = vrot.lane.b32.xlu0 %v2413_v44, %s2630_s8  ;;  %v1194_v47 = vsel %vm469_vm4, %v1192_v32, %v3548_v58 }
 0x19f   : > { %v3663_v4 = vsel %vm466_vm3, %v828_v38, %v769_v16  ;;  %394 = vrot.lane.b32.xlu1 %v2399_v10, %s2630_s8  ;;  %v2401_v16 = vcombine.low %v342_v50, %v342_v50  ;;  %v1171_v63 = vsel %vm456_vm0, %v4124_v57, %v3473_v46  ;;  %v1196_v46 = vsel %vm472_vm6, %v1194_v47, %v1152_v23  ;;  %s2635_s8 = smov [#allocation2]  }
 0x1a0   : > { %v1173_v44 = vsel %vm460_vm1, %v1171_v63, %v3494_v26  ;;  %v3701_v10 = vsel %vm475_vm5, %v1196_v46, %v1156_v21  ;;  %v2410_v26 = vcombine.low %v3391_v30, %v3391_v30  ;;  %v1201_v30 = vsel %vm456_vm0, %v4125_v19, %v3608_v61  ;;  %v3735_v61 = vpop.permute.xlu1 %796 }
 0x1a1   : > { %v1175_v13 = vsel %vm463_vm2, %v1173_v44, %v3570_v34  ;;  %v348_v34 = vpack.i.b16 %v245_v41, %v213_v51 }
 0x1a2   : > { %v813_v55 = vpop.permute.xlu0 %812  ;;  %442 = vrot.lane.b32.xlu0 %v2411_v59, %s2634_s17  ;;  %v1177_v14 = vsel %vm466_vm3, %v1175_v13, %v3587_v6  ;;  %v385_v59 = vshrl.u32 %v3620_v35, 16  ;;  %v386_v6 = vshrl.u32 %v3624_v54, 16 }
 0x1a3   : > { %v3679_v38 = vsel %vm456_vm0, %v4121_v18, %v813_v55  ;;  %398 = vrot.lane.b32.xlu1 %v2400_v40, %s2633_s11  ;;  %v1179_v58 = vsel %vm469_vm4, %v1177_v14, %v3573_v37  ;;  %v2017_v40 = vrot.slane %v3701_v10, 6  ;;  %v2403_v51 = vcombine.low %v348_v34, %v348_v34 }
 0x1a4   : > { %v1181_v23 = vsel %vm472_vm6, %v1179_v58, %v3610_v20  ;;  %v387_v35 = vpack.i.b16 %v386_v6, %v385_v59  ;;  %v1203_v20 = vsel %vm460_vm1, %v1201_v30, %v3581_v12  ;;  %v3741_v12 = vpop.permute.xlu1 %800  ;;  %v2146_v55 = vrot.slane %v3439_v43, 6 }
 0x1a5   : > { %v3721_v37 = vsel %vm475_vm5, %v1181_v23, %v1128_v48  ;;  %v3730_v41 = vsel %vm463_vm2, %v1203_v20, %v3626_v7  ;;  %v2147_v6 = vrot.slane %v3429_v53, 6 }
 0x1a6   : > { %414 = vrot.lane.b32.xlu0 %v2404_v9, %s2634_s17  ;;  %v2016_v54 = vrot.slane %v3721_v37, 6  ;;  %v2414_v36 = vcombine.low %v387_v35, %v387_v35  ;;  %v2027_v25 = vrot.slane %v3730_v41, 4  ;;  %v2018_v7 = vrot.slane %v3730_v41, 6 }
 0x1a7   : > { %402 = vrot.lane.b32.xlu1 %v2401_v16, %s2628_s6  ;;  %v1994_v15 = vrot.slane %v3721_v37, 4 }
 0x1a8   : > { %v3746_v48 = vpop.permute.xlu1 %772 }
 0x1aa   : > { %2010 = vrot.lane.b32.xlu0 %v3701_v10, %s2631_s9 }
 0x1ab   : > { %446 = vrot.lane.b32.xlu1 %v2412_v42, %s2629_s7  ;;  %s2559_s7 = scalar_lea.vmem %s4033_s30, 256 }
 0x1ac   : > { %p2560_p11 = scmp.ne.s32.totalorder %s4033_s30, %s2559_s7 }
 0x1ae   : > { %2021 = vrot.lane.b32.xlu0 %v2017_v40, %s2632_s10  ;;  %p2561_p12 = pnand %p2560_p11, %p2694_p5 }
 0x1af   : > { %438 = vrot.lane.b32.xlu1 %v2410_v26, %s2631_s9 }
 0x1b0   : > { %p2562_p13 = pneg %p2561_p12 }
 0x1b2   : > { %2019 = vrot.lane.b32.xlu0 %v2016_v54, %s2632_s10 }
 0x1b3   : > { %410 = vrot.lane.b32.xlu1 %v2403_v51, %s2631_s9 }
 0x1b6   : > { %2032 = vrot.lane.b32.xlu0 %v2027_v25, %s2628_s6 }
 0x1b7   : > { %454 = vrot.lane.b32.xlu1 %v2414_v36, %s2633_s11 }
 0x1bb   : > { %2253 = vrot.lane.b32.xlu1 %v4099_v5, %s2634_s17  ;;  %v1995_v5 = vrot.slane %v3701_v10, 4 }
 0x1be   : > { %v3749_v60 = vpop.permute.xlu1 %2175 }
 0x1bf   : > { %2012 = vrot.lane.b32.xlu1 %v3730_v41, %s2631_s9 }
 0x1c0   : > { %v2168_v50 = vpop.permute.xlu0 %2167 }
 0x1c2   : > { %v2157_v16 = vpop.permute.xlu1 %2156 }
 0x1c3   : > { %2023 = vrot.lane.b32.xlu1 %v2018_v7, %s2632_s10  ;;  %v4126_v7 = vpack.i.b16 %v3168_v45, %v3184_v0 }
 0x1c6   : > { %v2174_v52 = vpop.permute.xlu0 %2173 }
 0x1c7   : > { %v3753_v3 = vsel %vm469_vm4, %v2174_v52, %v3749_v60  ;;  %2008 = vrot.lane.b32.xlu1 %v3721_v37, %s2631_s9 }
 0x1cb   : > { %2030 = vrot.lane.b32.xlu1 %v1995_v5, %s2628_s6 }
 0x1ce   : > { %v2172_v8 = vpop.permute.xlu0 %2171 }
 0x1cf   : > { %v3763_v33 = vsel %vm469_vm4, %v2172_v8, %v2174_v52  ;;  %2028 = vrot.lane.b32.xlu1 %v1994_v15, %s2628_s6  ;;  %v839_v52 = vsel %vm456_vm0, %v4126_v7, %v3531_v1 }
 0x1d2   : > { %v2140_v9 = vpop.permute.xlu0 %2139 }
 0x1d3   : > { %v2199_v18 = vsel %vm2040_vm7, %v2140_v9, %v2146_v55  ;;  %v841_v55 = vsel %vm460_vm1, %v839_v52, %v3636_v49 }
 0x1d6   : > { %v2155_v24 = vpop.permute.xlu0 %2154 }
 0x1d7   : > { %v2159_v32 = vsel %vm475_vm5, %v2155_v24, %v2157_v16 }
 0x1da   : > { %v2153_v28 = vpop.permute.xlu0 %2152 }
 0x1db   : > { %v2158_v22 = vsel %vm475_vm5, %v2153_v28, %v2155_v24 }
 0x1dc   : > { %v2207_v57 = vsel %vm2045_vm8, %v2199_v18, %v2158_v22  ;;  %v843_v18 = vsel %vm463_vm2, %v841_v55, %v3670_v11  ;;  %v4127_v55 = vld [vmem:[#allocation5_spill] sm:$0xff] }
 0x1dd   : > { %v2114_v63 = vpop.permute.xlu1 %2113 }
 0x1de   : > { %v2184_v21 = vsel %vm2040_vm7, %v3464_v2, %v2114_v63  ;;  %v2148_v2 = vrot.slane %v3405_v17, 6 }
 0x1e0   : > { %v2112_v44 = vpop.permute.xlu0 %2111 }
 0x1e1   : > { %v2116_v43 = vsel %vm475_vm5, %v2112_v44, %v2114_v63  ;;  %v2125_v47 = vpop.permute.xlu1 %2124 }
 0x1e2   : > { %v2190_v13 = vsel %vm2045_vm8, %v2184_v21, %v2125_v47  ;;  %v2182_v14 = vsel %vm2040_vm7, %v3476_v27, %v2116_v43 }
 0x1e4   : > { %v2123_v42 = vpop.permute.xlu0 %2122 }
 0x1e5   : > { %v2127_v46 = vsel %vm472_vm6, %v2123_v42, %v2125_v47  ;;  %v2134_v26 = vpop.permute.xlu1 %2133 }
 0x1e6   : > { %v2188_v58 = vsel %vm2045_vm8, %v2182_v14, %v2127_v46  ;;  %v3782_v34 = vsel %vm2050_vm9, %v2190_v13, %v2134_v26 }
 0x1e8   : > { %v2132_v59 = vpop.permute.xlu0 %2131 }
 0x1e9   : > { %v2136_v23 = vsel %vm469_vm4, %v2132_v59, %v2134_v26  ;;  %v2142_v40 = vpop.permute.xlu1 %2141  ;;  %v832_v26 = vsel %vm469_vm4, %v3663_v4, %v3746_v48 }
 0x1ea   : > { %v2144_v19 = vsel %vm456_vm0, %v2140_v9, %v2142_v40  ;;  %v2205_v30 = vsel %vm2040_vm7, %v2142_v40, %v2148_v2  ;;  %v3790_v51 = vsel %vm2050_vm9, %v2188_v58, %v2136_v23  ;;  %v1998_v40 = vrot.slane %v3701_v10, 2 }
 0x1eb   : > { %v2202_v35 = vsel %vm2040_vm7, %v2144_v19, %v2147_v6  ;;  %v2211_v20 = vsel %vm2045_vm8, %v2205_v30, %v2157_v16 }
 0x1ec   : > { %v805_v54 = vpop.permute.xlu0 %804  ;;  %v2209_v17 = vsel %vm2045_vm8, %v2202_v35, %v2159_v32  ;;  %v3796_v36 = vsel %vm2050_vm9, %v2211_v20, %v2168_v50  ;;  %v1997_v35 = vrot.slane %v3721_v37, 2 }
 0x1ed   : > { %v2166_v53 = vpop.permute.xlu1 %2165 }
 0x1ee   : > { %v2170_v25 = vsel %vm472_vm6, %v2166_v53, %v2168_v50  ;;  %v845_v50 = vsel %vm466_vm3, %v843_v18, %v3735_v61  ;;  %v4128_v18 = vld [vmem:[#allocation8_spill] sm:$0xff] }
 0x1ef   : > { %v3805_v8 = vsel %vm2050_vm9, %v2209_v17, %v2170_v25  ;;  %v847_v45 = vsel %vm469_vm4, %v845_v50, %v3741_v12 }
 0x1f0   : > { %v419_v9 = vpop.permute.xlu0 %418  ;;  %v849_v1 = vsel %vm472_vm6, %v847_v45, %v805_v54  ;;  %v354_v54 = vpack.i.b16 %v3500_v39, %v3497_v62 }
 0x1f1   : > { %v2164_v16 = vpop.permute.xlu1 %2163 }
 0x1f2   : > { %v2169_v24 = vsel %vm472_vm6, %v2164_v16, %v2166_v53  ;;  %v1999_v53 = vrot.slane %v3730_v41, 2  ;;  %v480_v7 = vsel %vm456_vm0, %v354_v54, %v419_v9  ;;  %v330_v16 = vpack.i.b16 %v4128_v18, %v4127_v55 }
 0x1f3   : > { %v3817_v0 = vsel %vm2050_vm9, %v2207_v57, %v2169_v24  ;;  %v2220_v18 = vsel %vm2040_vm7, %v3763_v33, 0 }
 0x1f4   : > { %v809_v32 = vpop.permute.xlu0 %808 }
 0x1f5   : > { %v3821_v49 = vsel %vm475_vm5, %v849_v1, %v809_v32  ;;  %v2110_v28 = vpop.permute.xlu1 %2109 }
 0x1f6   : > { %v2115_v11 = vsel %vm475_vm5, %v2110_v28, %v2112_v44  ;;  %1977 = vrot.lane.b32.xlu0 %v3821_v49, %s2632_s10  ;;  %v1951_v61 = vrot.slane %v3821_v49, 6 }
 0x1f7   : > { %v2180_v12 = vsel %vm2040_vm7, %v3559_v31, %v2115_v11 }
 0x1f8   : > { %v391_v22 = vpop.permute.xlu0 %390 }
 0x1f9   : > { %v2121_v63 = vpop.permute.xlu1 %2120  ;;  %v459_v39 = vsel %vm456_vm0, %v330_v16, %v391_v22 }
 0x1fa   : > { %v2126_v57 = vsel %vm472_vm6, %v2121_v63, %v2123_v42  ;;  %1986 = vrot.lane.b32.xlu0 %v1951_v61, %s2628_s6 }
 0x1fb   : > { %v2186_v21 = vsel %vm2045_vm8, %v2180_v12, %v2126_v57  ;;  %v378_v12 = vpack.i.b16 %v3601_v56, %v3604_v29 }
 0x1fc   : > { %v781_v43 = vpop.permute.xlu0 %780 }
 0x1fd   : > { %v2130_v44 = vpop.permute.xlu1 %2129 }
 0x1fe   : > { %v2135_v47 = vsel %vm469_vm4, %v2130_v44, %v2132_v59 }
 0x1ff   : > { %v3836_v13 = vsel %vm2050_vm9, %v2186_v21, %v2135_v47 }
 0x200   : > { %v427_v14 = vpop.permute.xlu0 %426 }
 0x201   : > { %v817_v46 = vpop.permute.xlu1 %816 }
 0x202   : > { %v856_v59 = vsel %vm460_vm1, %v3679_v38, %v817_v46 }
 0x204   : > { %v431_v2 = vpop.permute.xlu0 %430 }
 0x205   : > { %v777_v42 = vpop.permute.xlu1 %776 }
 0x206   : > { %v834_v58 = vsel %vm472_vm6, %v832_v26, %v777_v42 }
 0x207   : > { %v3843_v6 = vsel %vm475_vm5, %v834_v58, %v781_v43 }
 0x208   : > { %1975 = vrot.lane.b32.xlu0 %v3843_v6, %s2632_s10  ;;  %v435_v4 = vpop.permute.xlu0 %434  ;;  %v1950_v20 = vrot.slane %v3843_v6, 6 }
 0x209   : > { %v821_v23 = vpop.permute.xlu1 %820 }
 0x20a   : > { %v3851_v19 = vsel %vm463_vm2, %v856_v59, %v821_v23  ;;  %v1965_v23 = vrot.slane %v3821_v49, 2 }
 0x20b   : > { %1979 = vrot.lane.b32.xlu1 %v3851_v19, %s2632_s10  ;;  %v1983_v48 = vrot.slane %v3851_v19, 6  ;;  %v1955_v26 = vrot.slane %v3851_v19, 4 }
 0x20c   : > { %2002 = vrot.lane.b32.xlu0 %v1998_v40, %s2634_s17  ;;  %v407_v17 = vpop.permute.xlu0 %406 }
 0x20d   : > { %v423_v30 = vpop.permute.xlu1 %422 }
 0x20e   : > { %v482_v52 = vsel %vm460_vm1, %v480_v7, %v423_v30 }
 0x20f   : > { %1988 = vrot.lane.b32.xlu1 %v1983_v48, %s2628_s6  ;;  %v484_v62 = vsel %vm463_vm2, %v482_v52, %v427_v14  ;;  %v1953_v48 = vrot.slane %v3843_v6, 4 }
 0x210   : > { %2000 = vrot.lane.b32.xlu0 %v1997_v35, %s2634_s17  ;;  %v451_v50 = vpop.permute.xlu0 %450  ;;  %v486_v1 = vsel %vm466_vm3, %v484_v62, %v431_v2  ;;  %v1954_v2 = vrot.slane %v3821_v49, 4  ;;  %v2224_v35 = vsel %vm2040_vm7, %v3749_v60, 0  ;;  %v2222_v60 = vsel %vm2040_vm7, %v3753_v3, 0 }
 0x211   : > { %v395_v38 = vpop.permute.xlu1 %394  ;;  %v488_v28 = vsel %vm469_vm4, %v486_v1, %v435_v4  ;;  %v1964_v3 = vrot.slane %v3843_v6, 2 }
 0x212   : > { %v462_v32 = vsel %vm460_vm1, %v459_v39, %v395_v38  ;;  %v1966_v38 = vrot.slane %v3851_v19, 2 }
 0x213   : > { %1984 = vrot.lane.b32.xlu1 %v1950_v20, %s2628_s6 }
 0x214   : > { %v443_v41 = vpop.permute.xlu0 %442 }
 0x215   : > { %v399_v25 = vpop.permute.xlu1 %398 }
 0x216   : > { %v465_v9 = vsel %vm463_vm2, %v462_v32, %v399_v25 }
 0x217   : > { %2004 = vrot.lane.b32.xlu1 %v1999_v53, %s2634_s17 }
 0x218   : > { %v415_v21 = vpop.permute.xlu0 %414 }
 0x219   : > { %v403_v24 = vpop.permute.xlu1 %402 }
 0x21a   : > { %v468_v63 = vsel %vm466_vm3, %v465_v9, %v403_v24 }
 0x21b   : > { %v471_v43 = vsel %vm469_vm4, %v468_v63, %v407_v17 }
 0x21c   : > { %v2011_v58 = vpop.permute.xlu0 %2010 }
 0x21d   : > { %v447_v45 = vpop.permute.xlu1 %446 }
 0x21e   : > { %v495_v47 = vsel %vm456_vm0, %v378_v12, %v447_v45 }
 0x21f   : > { %v497_v56 = vsel %vm460_vm1, %v495_v47, %v451_v50 }
 0x220   : > { %v2022_v40 = vpop.permute.xlu0 %2021 }
 0x221   : > { %v439_v11 = vpop.permute.xlu1 %438 }
 0x222   : > { %v490_v57 = vsel %vm472_vm6, %v488_v28, %v439_v11 }
 0x223   : > { %v3883_v22 = vsel %vm475_vm5, %v490_v57, %v443_v41 }
 0x224   : > { %1941 = vrot.lane.b32.xlu1 %v3883_v22, %s2628_s6  ;;  %v2020_v53 = vpop.permute.xlu0 %2019  ;;  %v1916_v33 = vrot.slane %v3883_v22, 4  ;;  %v1928_v50 = vrot.slane %v3883_v22, 2 }
 0x225   : > { %v411_v44 = vpop.permute.xlu1 %410  ;;  %v2025_v52 = vsel %vm469_vm4, %v2020_v53, %v2022_v40 }
 0x226   : > { %v474_v14 = vsel %vm472_vm6, %v471_v43, %v411_v44 }
 0x227   : > { %v3891_v46 = vsel %vm475_vm5, %v474_v14, %v415_v21 }
 0x228   : > { %1939 = vrot.lane.b32.xlu1 %v3891_v46, %s2628_s6  ;;  %v1927_v24 = vrot.slane %v3891_v46, 2  ;;  %v2033_v45 = vpop.permute.xlu0 %2032 }
 0x229   : > { %v455_v29 = vpop.permute.xlu1 %454 }
 0x22a   : > { %v499_v42 = vsel %vm463_vm2, %v497_v56, %v455_v29 }
 0x22b   : > { %1943 = vrot.lane.b32.xlu0 %v499_v42, %s2628_s6  ;;  %v1917_v16 = vrot.slane %v499_v42, 4  ;;  %s4031_s6 = scalar_lea.hbm %s4075_s3, %s2488_s28 }
 0x22c   : > { %1960 = vrot.lane.b32.xlu1 %v1955_v26, %s2634_s17 }
 0x22d   : > { %v2254_v59 = vpop.permute.xlu1 %2253 }
 0x22e   : > { %2275 = vmatprep.subr.bf16.mxu0 %v2254_v59 }
 0x22f   : > { %1958 = vrot.lane.b32.xlu0 %v1954_v2, %s2634_s17  ;;  %2276 = vmatpush1.bf16.msra.mxu0 %v2254_v59 }
 0x230   : > { %1969 = vrot.lane.b32.xlu1 %v1965_v23, %s2631_s9 }
 0x231   : > { %v2013_v4 = vpop.permute.xlu1 %2012 }
 0x232   : > { %v2015_v30 = vsel %vm472_vm6, %v2011_v58, %v2013_v4 }
 0x233   : > { %1956 = vrot.lane.b32.xlu0 %v1953_v48, %s2634_s17 }
 0x234   : > { %2251 = vrot.lane.b32.xlu1 %v2224_v35, %s2634_s17 }
 0x235   : > { %v2024_v54 = vpop.permute.xlu1 %2023 }
 0x236   : > { %v2026_v17 = vsel %vm469_vm4, %v2022_v40, %v2024_v54 }
 0x237   : > { %v3913_v25 = vsel %vm2040_vm7, %v2015_v30, %v2026_v17  ;;  %1971 = vrot.lane.b32.xlu0 %v1966_v38, %s2631_s9 }
 0x238   : > { %2239 = vrot.lane.b32.xlu1 %v3782_v34, %s2634_s17  ;;  %v1905_v34 = vrot.slane %v499_v42, 6 }
 0x239   : > { %v2009_v7 = vpop.permute.xlu1 %2008 }
 0x23a   : > { %v2014_v19 = vsel %vm472_vm6, %v2009_v7, %v2011_v58 }
 0x23b   : > { %v3923_v55 = vsel %vm2040_vm7, %v2014_v19, %v2025_v52  ;;  %2249 = vrot.lane.b32.xlu0 %v2222_v60, %s2634_s17 }
 0x23c   : > { %2243 = vrot.lane.b32.xlu1 %v3805_v8, %s2634_s17  ;;  %v1904_v8 = vrot.slane %v3883_v22, 6 }
 0x23d   : > { %v2031_v62 = vpop.permute.xlu1 %2030 }
 0x23e   : > { %v2035_v17 = vsel %vm466_vm3, %v2031_v62, %v2033_v45  ;;  %v4130_v45 = vrot.slane %v3559_v31, 2 }
 0x23f   : > { %2247 = vrot.lane.b32.xlu0 %v2220_v18, %s2634_s17  ;;  %v2098_v18 = vsel %vm2045_vm8, %v3913_v25, %v2035_v17 }
 0x240   : > { %2241 = vrot.lane.b32.xlu1 %v3817_v0, %s2634_s17  ;;  %v1915_v0 = vrot.slane %v3891_v46, 4 }
 0x241   : > { %v2029_v39 = vpop.permute.xlu1 %2028 }
 0x242   : > { %v2034_v52 = vsel %vm466_vm3, %v2029_v39, %v2031_v62 }
 0x243   : > { %2245 = vrot.lane.b32.xlu0 %v3796_v36, %s2634_s17  ;;  %v1903_v36 = vrot.slane %v3891_v46, 6 }
 0x244   : > { %1967 = vrot.lane.b32.xlu1 %v1964_v3, %s2631_s9 }
 0x247   : > { %2237 = vrot.lane.b32.xlu0 %v3790_v51, %s2634_s17  ;;  %v1929_v51 = vrot.slane %v499_v42, 2 }
 0x248   : > { %1910 = vrot.lane.b32.xlu1 %v1905_v34, %s2634_s17 }
 0x24b   : > { %2235 = vrot.lane.b32.xlu0 %v3836_v13, %s2634_s17  ;;  %v2269_v13 = vld [vmem:[%s4074_s2] sm:$0xff] }
 0x24c   : > { %1920 = vrot.lane.b32.xlu1 %v1916_v33, %s2631_s9 }
 0x24f   : > { %1908 = vrot.lane.b32.xlu0 %v1904_v8, %s2634_s17 }
 0x250   : > { %1918 = vrot.lane.b32.xlu1 %v1915_v0, %s2631_s9 }
 0x253   : > { %1906 = vrot.lane.b32.xlu0 %v1903_v36, %s2634_s17 }
 0x254   : > { %1934 = vrot.lane.b32.xlu1 %v1929_v51, %s2632_s10  ;;  %v4129_v51 = vrot.slane %v3476_v27, 2 }
 0x257   : > { %1922 = vrot.lane.b32.xlu0 %v1917_v16, %s2631_s9  ;;  %v2103_v16 = vsel %vm2050_vm9, %v2098_v18, %v4129_v51  ;;  %s2563_s9 = sshll.u32 %s2635_s8, 4  ;;  %s2564_s9 = int_to_ptr.vmem [resolvable:$false] %s2563_s9 }
 0x258   : > { %2272 = vperm.xlu1 %2543, %v2269_v13   ;;  %v2096_v13 = vsel %vm2045_vm8, %v3923_v55, %v2034_v52  ;;  %p2566_p0 = scmp.lt.s32.totalorder %s4033_s30, %s2564_s9 }
 0x25b   : > { %1932 = vrot.lane.b32.xlu0 %v1928_v50, %s2632_s10 }
 0x25f   : > { %1930 = vrot.lane.b32.xlu0 %v1927_v24, %s2632_s10  ;;  %s2565_s10 = scalar_lea.vmem %s2564_s9, 512 }
 0x260   : > { %p2567_p1 = scmp.lt.s32.totalorder %s2565_s10, %s2559_s7 }
 0x262   : > { %p2568_p2 = por %p2567_p1, %p2566_p0 }
 0x264   : > { %p2569_p3 = pnand %p2568_p2, %p2562_p13 }
 0x268   : > { %v1978_v41 = vpop.permute.xlu0 %1977 }
 0x26c   : > { %v1987_v9 = vpop.permute.xlu0 %1986 }
 0x27a   : > { %v1976_v11 = vpop.permute.xlu0 %1975 }
 0x27b   : > { %v1981_v0 = vsel %vm469_vm4, %v1976_v11, %v1978_v41 }
 0x27d   : > { %v1980_v1 = vpop.permute.xlu1 %1979 }
 0x27e   : > { %v2003_v12 = vpop.permute.xlu0 %2002  ;;  %v1982_v33 = vsel %vm469_vm4, %v1978_v41, %v1980_v1  ;;  %v2100_v1 = vsel %vm2050_vm9, %v2096_v13, %v4130_v45 }
 0x281   : > { %v1989_v32 = vpop.permute.xlu1 %1988 }
 0x282   : > { %v2001_v21 = vpop.permute.xlu0 %2000  ;;  %v1991_v19 = vsel %vm466_vm3, %v1987_v9, %v1989_v32 }
 0x283   : > { %v2078_v36 = vsel %vm2040_vm7, %v1982_v33, %v1991_v19  ;;  %v2006_v31 = vsel %vm475_vm5, %v2001_v21, %v2003_v12 }
 0x284   : > { %v2082_v27 = vsel %vm2045_vm8, %v2078_v36, %v1995_v5 }
 0x285   : > { %v1985_v28 = vpop.permute.xlu1 %1984 }
 0x286   : > { %v1990_v3 = vsel %vm466_vm3, %v1985_v28, %v1987_v9 }
 0x287   : > { %v2075_v25 = vsel %vm2040_vm7, %v1981_v0, %v1990_v3 }
 0x288   : > { %v2080_v32 = vsel %vm2045_vm8, %v2075_v25, %v1994_v15 }
 0x289   : > { %v2005_v63 = vpop.permute.xlu1 %2004 }
 0x28a   : > { %v2007_v50 = vsel %vm475_vm5, %v2003_v12, %v2005_v63  ;;  %v2084_v63 = vsel %vm2050_vm9, %v2080_v32, %v2006_v31 }
 0x28b   : > { %v2087_v55 = vsel %vm2050_vm9, %v2082_v27, %v2007_v50 }
 0x296   : > { %v1942_v57 = vpop.permute.xlu1 %1941 }
 0x29a   : > { %v1940_v43 = vpop.permute.xlu1 %1939 }
 0x29b   : > { %v1946_v28 = vsel %vm466_vm3, %v1940_v43, %v1942_v57 }
 0x29c   : > { %v2059_v12 = vsel %vm2040_vm7, %v1946_v28, %v1950_v20 }
 0x29d   : > { %v1944_v44 = vpop.permute.xlu0 %1943 }
 0x29e   : > { %v1961_v47 = vpop.permute.xlu1 %1960  ;;  %v1947_v39 = vsel %vm466_vm3, %v1942_v57, %v1944_v44 }
 0x29f   : > { %v2062_v10 = vsel %vm2040_vm7, %v1947_v39, %v1951_v61 }
 0x2a1   : > { %v1959_v14 = vpop.permute.xlu0 %1958 }
 0x2a2   : > { %v1970_v56 = vpop.permute.xlu1 %1969  ;;  %v1963_v41 = vsel %vm475_vm5, %v1959_v14, %v1961_v47 }
 0x2a3   : > { %v2066_v37 = vsel %vm2045_vm8, %v2062_v10, %v1963_v41 }
 0x2a5   : > { %v1957_v29 = vpop.permute.xlu0 %1956 }
 0x2a6   : > { %v2252_v26 = vpop.permute.xlu1 %2251  ;;  %v1962_v11 = vsel %vm475_vm5, %v1957_v29, %v1959_v14 }
 0x2a7   : > { %v2064_v61 = vsel %vm2045_vm8, %v2059_v12, %v1962_v11 }
 0x2a9   : > { %v1972_v42 = vpop.permute.xlu0 %1971 }
 0x2aa   : > { %v2240_v58 = vpop.permute.xlu1 %2239  ;;  %v1974_v9 = vsel %vm472_vm6, %v1970_v56, %v1972_v42 }
 0x2ab   : > { %v2071_v47 = vsel %vm2050_vm9, %v2066_v37, %v1974_v9 }
 0x2ad   : > { %v2250_v2 = vpop.permute.xlu0 %2249 }
 0x2ae   : > { %v2244_v59 = vpop.permute.xlu1 %2243  ;;  %v2260_v23 = vsel %vm475_vm5, %v2250_v2, %v2252_v26 }
 0x2af   : > { %2277 = vmatprep.subr.bf16.mxu0 %v2260_v23 }
 0x2b1   : > { %v2248_v40 = vpop.permute.xlu0 %2247 }
 0x2b2   : > { %v2242_v4 = vpop.permute.xlu1 %2241  ;;  %v2259_v48 = vsel %vm475_vm5, %v2248_v40, %v2250_v2 }
 0x2b3   : > { %2278 = vmatpush1.bf16.msra.mxu0 %v2259_v48  ;;  %v2257_v54 = vsel %vm475_vm5, %v2242_v4, %v2244_v59  ;;  %v2268_v4 = vld [vmem:[%s4073_s1] sm:$0xf] }
 0x2b5   : > { %v2246_v30 = vpop.permute.xlu0 %2245 }
 0x2b6   : > { %v1968_v35 = vpop.permute.xlu1 %1967  ;;  %v2258_v38 = vsel %vm475_vm5, %v2244_v59, %v2246_v30 }
 0x2b7   : > { %2279 = vmatprep.subr.bf16.mxu0 %v2258_v38  ;;  %v1973_v15 = vsel %vm472_vm6, %v1968_v35, %v1970_v56 }
 0x2b8   : > { %2280 = vmatpush1.bf16.msra.mxu0 %v2257_v54  ;;  %v2068_v21 = vsel %vm2050_vm9, %v2064_v61, %v1973_v15 }
 0x2b9   : > { %v2238_v53 = vpop.permute.xlu0 %2237 }
 0x2ba   : > { %v2256_v7 = vsel %vm475_vm5, %v2238_v53, %v2240_v58  ;;  %v1911_v60 = vpop.permute.xlu1 %1910 }
 0x2bb   : > { %2281 = vmatprep.subr.bf16.mxu0 %v2256_v7 }
 0x2bd   : > { %v2236_v34 = vpop.permute.xlu0 %2235 }
 0x2be   : > { %v2255_v8 = vsel %vm475_vm5, %v2236_v34, %v2238_v53  ;;  %v1921_v24 = vpop.permute.xlu1 %1920 }
 0x2bf   : > { %2282 = vmatpush1.bf16.msra.mxu0 %v2255_v8 }
 0x2c0   : > { %2283 = vmatprep.subr.bf16.mxu0 %v2103_v16 }
 0x2c1   : > { %v1909_v62 = vpop.permute.xlu0 %1908 }
 0x2c2   : > { %v1919_v44 = vpop.permute.xlu1 %1918  ;;  %v1914_v57 = vsel %vm475_vm5, %v1909_v62, %v1911_v60 }
 0x2c3   : > { %2284 = vmatpush1.bf16.msra.mxu0 %v2100_v1  ;;  %v2044_v56 = vsel %vm2040_vm7, %v3883_v22, %v1914_v57  ;;  %v1925_v2 = vsel %vm472_vm6, %v1919_v44, %v1921_v24 }
 0x2c4   : > { %2285 = vmatprep.subr.bf16.mxu0 %v2087_v55 }
 0x2c5   : > { %v1907_v5 = vpop.permute.xlu0 %1906 }
 0x2c6   : > { %v1913_v14 = vsel %vm475_vm5, %v1907_v5, %v1909_v62  ;;  %v1935_v6 = vpop.permute.xlu1 %1934 }
 0x2c7   : > { %2286 = vmatpush1.bf16.msra.mxu0 %v2084_v63  ;;  %v2042_v42 = vsel %vm2040_vm7, %v3891_v46, %v1913_v14 }
 0x2c8   : > { %2287 = vmatprep.subr.bf16.mxu0 %v2071_v47  ;;  %v2047_v22 = vsel %vm2045_vm8, %v2042_v42, %v1925_v2 }
 0x2c9   : > { %v1923_v49 = vpop.permute.xlu0 %1922 }
 0x2ca   : > { %v1926_v43 = vsel %vm472_vm6, %v1921_v24, %v1923_v49 }
 0x2cb   : > { %2288 = vmatpush1.bf16.msra.mxu0 %v2068_v21  ;;  %v2049_v26 = vsel %vm2045_vm8, %v2044_v56, %v1926_v43 }
 0x2cd   : > { %v1933_v29 = vpop.permute.xlu0 %1932 }
 0x2ce   : > { %v1938_v20 = vsel %vm469_vm4, %v1933_v29, %v1935_v6 }
 0x2cf   : > { %v2055_v58 = vsel %vm2050_vm9, %v2049_v26, %v1938_v20 }
 0x2d0   : > { %2289 = vmatprep.subr.bf16.mxu0 %v2055_v58 }
 0x2d1   : > { %v1931_v59 = vpop.permute.xlu0 %1930 }
 0x2d2   : > { %v1937_v23 = vsel %vm469_vm4, %v1931_v59, %v1933_v29 }
 0x2d3   : > { %v2052_v40 = vsel %vm2050_vm9, %v2047_v22, %v1937_v23  ;;  %v2273_v46 = vpop.permute.xlu1 %2272 }
 0x2d4   : > { %2290 = vmatpush1.bf16.msra.mxu0 %v2052_v40 }
 0x2d7   : > { %2308 = vmatmul.mubr.bf16.vlgmr.msra.gmra.mxu0 %v2268_v4 }
 0x397   : > { %v2309_v48 = vpop.f32.mrf.mxu0 }
 0x398   : > { %v2310_v30 = vadd.f32 %v2309_v48, %v2273_v46 }
 0x399   : > { %v2311_v35 = vpop.f32.mrf.mxu0 }
 0x39a   : > { %2316 = vst [vmem:[%s163_s29] sm:$0xff] %v2310_v30  ;;  %v2312_v38 = vadd.f32 %v2311_v35, %v2273_v46 }
 0x39b   : > { %v2313_v54 = vpop.f32.mrf.mxu0 }
 0x39c   : > { %2317 = vst [vmem:[%s163_s29 + $0x8] sm:$0xff] %v2312_v38 }
 0x39d   : > { %v2314_v17 = vpop.f32.mrf.mxu0 }
 0x39e   : > { %2572 = shalt.err (!%p2569_p3)
}
 0x39f   : > { %s2573_s11 = scalar_lea.hbm %s4031_s6, 256  ;;  %s2577_s20 = scalar_lea.hbm %s4075_s3, 512 }
 0x3a0   : > { %p2574_p4 = scmp.ne.s32.totalorder %s4031_s6, %s2573_s11  ;;  %p2578_p9 = scmp.lt.s32.totalorder %s4031_s6, %s4075_s3 }
 0x3a1   : > { %p2579_p10 = scmp.lt.s32.totalorder %s2577_s20, %s2573_s11 }
 0x3a2   : > { %p2575_p7 = pnand %p2574_p4, %p2694_p5 }
 0x3a3   : > { %p2580_p11 = por %p2579_p10, %p2578_p9 }
 0x3a4   : > { %p2576_p8 = pneg %p2575_p7 }
 0x3a6   : > { %p2581_p12 = pnand %p2580_p11, %p2576_p8 }
 0x3a8   : > { %2584 = shalt.err (!%p2581_p12)
}
 0x3a9   : > { %2490 = dma.vmem_to_hbm [thread:$0]  (%p2694_p5), %s4033_s30, 256, %s4031_s6, %s2319_s16  }
 0x3aa PF: > { %p2496_p13 = scmp.ge.s32.totalorder %s2619_s15, 2  ;;  %s2345_s26 = sand.u32 1, %s2607_s12  }
 0x3ab   : > { %s2346_s27 = scalar_lea.sflag [#allocation3], %s2345_s26 }
 0x3ac   : > { %p2493_p0 = pnand %p2496_p13, %p2698_p6 }
 0x3ae   : > { %p2494_p1 = pneg %p2493_p0 }
 0x3b0   : > { %2602 = dma.done.wait (%p2494_p1), %s2346_s27, 256  }
 0x3b1   : > { %2604 = vsyncadd (%p2494_p1), %s2346_s27, 4294967040  ;;  %p13_p2 = scmp.ge.s32.totalorder %s2681_s18, 4   ;;  %s4131_s12 = smov %s2611_s13 }
 0x3b2   : > { %s4132_s13 = smov %s2615_s14  ;;  %s4133_s14 = smov %s2692_s21 }
 0x3b3   : > { %s4134_s15 = smov %s2681_s18  ;;  %15 = sbr.rel (!%p13_p2) target bundleno = 3 (0x3), region = 67 }
 0x3b8   :  { %2351 = vsyncpa [#allocation3], 1 }
 0x3b9   :  { %2353 = vsyncpa [#allocation3 + $0x1], 1 }

</bundles_post_ra>
